<compile_context>
chip_gen: v6e
topology: v6e:2x2x1
jax: 0.10.0
libtpu: 0.0.40
codegen_flags: <defaults>
</compile_context>

<pallas_src>
import functools

import jax
import jax.numpy as jnp
from jax.experimental import pallas as pl
from jax.experimental.pallas import tpu as pltpu


# ----------------------------- helpers ----------------------------------------

def _round_up(v, m):
    return ((v + m - 1) // m) * m


def _device_kind():
    try:
        return jax.devices()[0].device_kind.lower()
    except Exception:  # pragma: no cover - defensive; TPU is the default backend
        return ""


def _num_megacore_tcs(kind):
    # v4 / v5p / v7x expose 2 TensorCores to one Pallas "parallel" grid axis.
    return 2 if any(tag in kind for tag in ("v4", "v5p", "v7", "7x")) else 1


def _default_hidden_dtype(kind, compute_dtype):
    # bf16 elementwise tail only pays off where the VPU has native bf16
    # (v6e / v7x); keep the f32 tail elsewhere (v5e has no bf16 VPU).
    if compute_dtype == jnp.bfloat16 and any(t in kind for t in ("v6", "v7", "7x")):
        return jnp.bfloat16
    return jnp.float32


def _choose_tm(n, desired_tm, min_rows, n_cores):
    """Largest sublane-aligned row tile <= desired that never exceeds the
    problem size and keeps the grid split evenly across megacore TCs."""
    tm = min(desired_tm, _round_up(n, min_rows))
    if n_cores > 1:
        per_core = _round_up(pl.cdiv(n, n_cores), min_rows)
        tm = min(tm, per_core)            # don't collapse the grid to 1 step
    tm = max(min_rows, (tm // min_rows) * min_rows)
    return tm


# ----------------------------- kernel -----------------------------------------

def _fused_kernel(num_res, hidden_dtype, x_ref, w1_ref, b1_ref, *rest):
    """Whole DimReduction1 forward for one row tile.

    rest = (res_stack_ref, o_ref) if num_res > 0 else (o_ref,)
    Weights arrive pre-cast to the MXU operand dtype; the bias / residual adds
    stay in f32; the intra-block intermediate uses `hidden_dtype`.
    """
    if num_res:
        res_ref, o_ref = rest
    else:
        (o_ref,) = rest

    mxu_dtype = w1_ref.dtype
    x = x_ref[...].astype(jnp.float32)                    # f32 residual path

    # fc1 (with bias) + residual add + ReLU, fused.
    y = jnp.dot(x.astype(mxu_dtype), w1_ref[...],
                preferred_element_type=jnp.float32)
    y = jnp.maximum(y + b1_ref[...] + x, 0.0)

    # Residual blocks: y = y + relu(relu(y@Wa)@Wb), bias-free Linears.
    for ii in range(num_res):
        wa = res_ref[2 * ii]
        wb = res_ref[2 * ii + 1]
        h = jnp.dot(y.astype(mxu_dtype), wa,
                    preferred_element_type=hidden_dtype)
        h = jnp.maximum(h, 0)                              # stays hidden_dtype
        t = jnp.dot(h.astype(mxu_dtype), wb,
                    preferred_element_type=jnp.float32)
        y = y + jnp.maximum(t, 0.0)

    o_ref[...] = y.astype(o_ref.dtype)


# ----------------------------- param prep (one-time) ---------------------------

def prepare_params(params, compute_dtype=jnp.bfloat16):
    """Cast / stack weights ONCE outside the jitted forward (review item:
    no per-call convert HLOs)."""
    d = params["w1"].shape[0]
    prepped = {
        "w1": jnp.asarray(params["w1"], compute_dtype),          # (D, D) in->out
        "b1": jnp.asarray(params["b1"], jnp.float32).reshape(1, d),
    }
    if params["res"]:
        flat = [w for pair in params["res"] for w in pair]        # wa0, wb0, ...
        prepped["res_stack"] = jnp.stack(flat).astype(compute_dtype)  # (2R, D, D)
    return prepped


# ----------------------------- wrapper -----------------------------------------

def dim_reduction1_forward(x, params, *, tm=512, hidden_dtype=None):
    """Fused Pallas forward pass of DimReduction1.

    params = prepare_params(...) output:
      "w1": (D, D) compute-dtype, "b1": (1, D) f32, "res_stack": (2R, D, D).
    """
    n, d = x.shape
    w1 = params["w1"]
    b1 = params["b1"]
    res_stack = params.get("res_stack", None)
    num_res = 0 if res_stack is None else res_stack.shape[0] // 2
    compute_dtype = w1.dtype

    kind = _device_kind()
    n_cores = _num_megacore_tcs(kind)
    if hidden_dtype is None:
        hidden_dtype = _default_hidden_dtype(kind, compute_dtype)

    # Sublane packing: bf16/f16 operands want >=16-row tiles, f32 >=8.
    min_rows = 16 if jnp.dtype(compute_dtype).itemsize == 2 else 8
    tm = _choose_tm(n, tm, min_rows, n_cores)
    grid = (pl.cdiv(n, tm),)          # ragged last block: Pallas masks the store

    def _const_spec(shape):
        rank = len(shape)
        return pl.BlockSpec(shape, lambda i, _r=rank: (0,) * _r)

    in_specs = [pl.BlockSpec((tm, d), lambda i: (i, 0)),
                _const_spec(w1.shape),
                _const_spec(b1.shape)]
    operands = [x, w1, b1]
    if num_res:
        in_specs.append(_const_spec(res_stack.shape))
        operands.append(res_stack)

    out_spec = pl.BlockSpec((tm, d), lambda i: (i, 0))

    flops = 2 * n * d * d * (1 + 2 * num_res)
    bytes_accessed = (sum(int(a.size) * a.dtype.itemsize for a in operands)
                      + n * d * x.dtype.itemsize)

    # VMEM budget: double-buffered x/out tiles + (double-buffered) weight slab.
    weight_bytes = sum(int(a.size) * a.dtype.itemsize for a in operands[1:])
    act_tile_bytes = tm * d * (x.dtype.itemsize + x.dtype.itemsize)
    vmem_limit = int(min(64 << 20,
                         max(2 * (weight_bytes + act_tile_bytes) + (2 << 20),
                             16 << 20)))

    kernel = functools.partial(_fused_kernel, num_res, hidden_dtype)

    return pl.pallas_call(
        kernel,
        out_shape=jax.ShapeDtypeStruct((n, d), x.dtype),
        grid_spec=pltpu.PrefetchScalarGridSpec(
            num_scalar_prefetch=0,
            grid=grid,
            in_specs=in_specs,
            out_specs=out_spec,
        ),
        compiler_params=pltpu.CompilerParams(
            dimension_semantics=("parallel",),
            vmem_limit_bytes=vmem_limit),
        cost_estimate=pl.CostEstimate(
            flops=int(flops), transcendentals=0,
            bytes_accessed=int(bytes_accessed)),
    )(*operands)


# ----------------------------- reference ---------------------------------------

def dim_reduction1_ref(x, params, compute_dtype=jnp.bfloat16):
    """Pure-JAX reference with the same bf16-operand / f32-accumulate math."""
    x32 = x.astype(jnp.float32)
    y = jnp.dot(x.astype(compute_dtype), params["w1"].astype(compute_dtype),
                preferred_element_type=jnp.float32)
    y = jnp.maximum(y + params["b1"].astype(jnp.float32).reshape(1, -1) + x32, 0.0)
    for wa, wb in params["res"]:
        h = jnp.maximum(
            jnp.dot(y.astype(compute_dtype), wa.astype(compute_dtype),
                    preferred_element_type=jnp.float32), 0.0)
        t = jnp.maximum(
            jnp.dot(h.astype(compute_dtype), wb.astype(compute_dtype),
                    preferred_element_type=jnp.float32), 0.0)
        y = y + t
    return y


# ----------------------------- init / main --------------------------------------

def init_params(key, d, num_res):
    # Deterministic synthetic init (roughly PyTorch's U(-1/sqrt(fan_in), ...)).
    lim = 1.0 / jnp.sqrt(jnp.float32(d))
    keys = jax.random.split(key, 2 + 2 * num_res)
    w1 = jax.random.uniform(keys[0], (d, d), jnp.float32, -lim, lim)
    b1 = jax.random.uniform(keys[1], (1, d), jnp.float32, -lim, lim)
    res = []
    for ii in range(num_res):
        wa = jax.random.uniform(keys[2 + 2 * ii], (d, d), jnp.float32, -lim, lim)
        wb = jax.random.uniform(keys[3 + 2 * ii], (d, d), jnp.float32, -lim, lim)
        res.append((wa, wb))
    return {"w1": w1, "b1": b1, "res": res}


if __name__ == "__main__":
    key = jax.random.PRNGKey(0)
    kx, kp = jax.random.split(key)

    # n_channels == m_dim == 128 (required by the `x + fc1(x)` residual add).
    N, D = 512, 128
    NUM_RES = 2             # numLayer_Res

    x = jax.random.normal(kx, (N, D), jnp.float32)
    params = init_params(kp, D, NUM_RES)
    prepped = prepare_params(params)             # one-time cast/stack, outside jit

    fwd = jax.jit(functools.partial(dim_reduction1_forward, tm=512))

    # 1) even-grid case
    out = jax.block_until_ready(fwd(x, prepped))
    ref = dim_reduction1_ref(x, params)
    assert out.shape == (N, D) and out.dtype == x.dtype
    err = float(jnp.max(jnp.abs(out - ref)))
    assert jnp.allclose(out, ref, atol=2e-2, rtol=2e-2), \
        f"mismatch vs reference (max abs err = {err})"

    # 2) ragged-N case (exercises the masked partial-block store; no pad/slice)
    N2 = 300
    x2 = x[:N2]
    out2 = jax.block_until_ready(fwd(x2, prepped))
    assert out2.shape == (N2, D) and out2.dtype == x.dtype
    err2 = float(jnp.max(jnp.abs(out2 - ref[:N2])))
    assert jnp.allclose(out2, ref[:N2], atol=2e-2, rtol=2e-2), \
        f"ragged-N mismatch vs reference (max abs err = {err2})"

    print("KERNEL_OK")
</pallas_src>

<mosaic_0001>
module attributes {stable_mosaic.version = 11 : i64} {
  func.func @_fused_kernel(%arg0: i32, %arg1: memref<512x128xf32, #tpu.memory_space<vmem>>, %arg2: memref<128x128xbf16, #tpu.memory_space<vmem>>, %arg3: memref<1x128xf32, #tpu.memory_space<vmem>>, %arg4: memref<4x128x128xbf16, #tpu.memory_space<vmem>>, %arg5: memref<512x128xf32, #tpu.memory_space<vmem>>) attributes {dimension_semantics = [#tpu.dimension_semantics<parallel>], iteration_bounds = array<i64: 1>, scalar_prefetch = 0 : i64, scratch_operands = 0 : i64, tpu.core_type = #tpu.core_type<tc>, window_params = [{transform_indices = @transform_0, window_bounds = array<i64: 512, 128>}, {pipeline_mode = #tpu.pipeline_mode<synchronous>, transform_indices = @transform_1, window_bounds = array<i64: 128, 128>}, {pipeline_mode = #tpu.pipeline_mode<synchronous>, transform_indices = @transform_2, window_bounds = array<i64: 1, 128>}, {pipeline_mode = #tpu.pipeline_mode<synchronous>, transform_indices = @transform_3, window_bounds = array<i64: 4, 128, 128>}, {transform_indices = @transform_4, window_bounds = array<i64: 512, 128>}]} {
    %c0 = arith.constant 0 : index
    %c0_0 = arith.constant 0 : index
    %0 = vector.load %arg1[%c0, %c0_0] : memref<512x128xf32, #tpu.memory_space<vmem>>, vector<512x128xf32>
    %1 = arith.truncf %0 : vector<512x128xf32> to vector<512x128xbf16>
    %c0_1 = arith.constant 0 : index
    %c0_2 = arith.constant 0 : index
    %2 = vector.load %arg2[%c0_1, %c0_2] : memref<128x128xbf16, #tpu.memory_space<vmem>>, vector<128x128xbf16>
    %cst = arith.constant dense<0.000000e+00> : vector<512x128xf32>
    %3 = tpu.matmul %1, %2, %cst {dimension_numbers = #tpu.dot_dimension_numbers<[1], [0], [0], [1], [0, 0, 1, 1], [], []>} : vector<512x128xbf16>, vector<128x128xbf16>, vector<512x128xf32> -> vector<512x128xf32>
    %c0_3 = arith.constant 0 : index
    %c0_4 = arith.constant 0 : index
    %4 = vector.load %arg3[%c0_3, %c0_4] : memref<1x128xf32, #tpu.memory_space<vmem>>, vector<1x128xf32>
    %5 = vector.broadcast %4 : vector<1x128xf32> to vector<512x128xf32>
    %6 = arith.addf %3, %5 : vector<512x128xf32>
    %7 = arith.addf %6, %0 : vector<512x128xf32>
    %cst_5 = arith.constant 0.000000e+00 : f32
    %8 = vector.broadcast %cst_5 : f32 to vector<512x128xf32>
    %9 = arith.maximumf %7, %8 : vector<512x128xf32>
    %c0_6 = arith.constant 0 : index
    %c0_7 = arith.constant 0 : index
    %c0_8 = arith.constant 0 : index
    %10 = vector.load %arg4[%c0_6, %c0_7, %c0_8] : memref<4x128x128xbf16, #tpu.memory_space<vmem>>, vector<1x128x128xbf16>
    %11 = vector.shape_cast %10 : vector<1x128x128xbf16> to vector<128x128xbf16>
    %c1 = arith.constant 1 : index
    %c0_9 = arith.constant 0 : index
    %c0_10 = arith.constant 0 : index
    %12 = vector.load %arg4[%c1, %c0_9, %c0_10] : memref<4x128x128xbf16, #tpu.memory_space<vmem>>, vector<1x128x128xbf16>
    %13 = vector.shape_cast %12 : vector<1x128x128xbf16> to vector<128x128xbf16>
    %14 = arith.truncf %9 : vector<512x128xf32> to vector<512x128xbf16>
    %cst_11 = arith.constant dense<0.000000e+00> : vector<512x128xf32>
    %15 = tpu.matmul %14, %11, %cst_11 {dimension_numbers = #tpu.dot_dimension_numbers<[1], [0], [0], [1], [0, 0, 1, 1], [], []>} : vector<512x128xbf16>, vector<128x128xbf16>, vector<512x128xf32> -> vector<512x128xf32>
    %cst_12 = arith.constant 0.000000e+00 : f32
    %16 = vector.broadcast %cst_12 : f32 to vector<512x128xf32>
    %17 = arith.maximumf %15, %16 : vector<512x128xf32>
    %18 = arith.truncf %17 : vector<512x128xf32> to vector<512x128xbf16>
    %cst_13 = arith.constant dense<0.000000e+00> : vector<512x128xf32>
    %19 = tpu.matmul %18, %13, %cst_13 {dimension_numbers = #tpu.dot_dimension_numbers<[1], [0], [0], [1], [0, 0, 1, 1], [], []>} : vector<512x128xbf16>, vector<128x128xbf16>, vector<512x128xf32> -> vector<512x128xf32>
    %cst_14 = arith.constant 0.000000e+00 : f32
    %20 = vector.broadcast %cst_14 : f32 to vector<512x128xf32>
    %21 = arith.maximumf %19, %20 : vector<512x128xf32>
    %22 = arith.addf %9, %21 : vector<512x128xf32>
    %c2 = arith.constant 2 : index
    %c0_15 = arith.constant 0 : index
    %c0_16 = arith.constant 0 : index
    %23 = vector.load %arg4[%c2, %c0_15, %c0_16] : memref<4x128x128xbf16, #tpu.memory_space<vmem>>, vector<1x128x128xbf16>
    %24 = vector.shape_cast %23 : vector<1x128x128xbf16> to vector<128x128xbf16>
    %c3 = arith.constant 3 : index
    %c0_17 = arith.constant 0 : index
    %c0_18 = arith.constant 0 : index
    %25 = vector.load %arg4[%c3, %c0_17, %c0_18] : memref<4x128x128xbf16, #tpu.memory_space<vmem>>, vector<1x128x128xbf16>
    %26 = vector.shape_cast %25 : vector<1x128x128xbf16> to vector<128x128xbf16>
    %27 = arith.truncf %22 : vector<512x128xf32> to vector<512x128xbf16>
    %cst_19 = arith.constant dense<0.000000e+00> : vector<512x128xf32>
    %28 = tpu.matmul %27, %24, %cst_19 {dimension_numbers = #tpu.dot_dimension_numbers<[1], [0], [0], [1], [0, 0, 1, 1], [], []>} : vector<512x128xbf16>, vector<128x128xbf16>, vector<512x128xf32> -> vector<512x128xf32>
    %cst_20 = arith.constant 0.000000e+00 : f32
    %29 = vector.broadcast %cst_20 : f32 to vector<512x128xf32>
    %30 = arith.maximumf %28, %29 : vector<512x128xf32>
    %31 = arith.truncf %30 : vector<512x128xf32> to vector<512x128xbf16>
    %cst_21 = arith.constant dense<0.000000e+00> : vector<512x128xf32>
    %32 = tpu.matmul %31, %26, %cst_21 {dimension_numbers = #tpu.dot_dimension_numbers<[1], [0], [0], [1], [0, 0, 1, 1], [], []>} : vector<512x128xbf16>, vector<128x128xbf16>, vector<512x128xf32> -> vector<512x128xf32>
    %cst_22 = arith.constant 0.000000e+00 : f32
    %33 = vector.broadcast %cst_22 : f32 to vector<512x128xf32>
    %34 = arith.maximumf %32, %33 : vector<512x128xf32>
    %35 = arith.addf %22, %34 : vector<512x128xf32>
    %c0_23 = arith.constant 0 : index
    %c0_24 = arith.constant 0 : index
    %36 = vector.load %arg5[%c0_23, %c0_24] : memref<512x128xf32, #tpu.memory_space<vmem>>, vector<512x128xf32>
    tpu.vector_store %arg5[%c0_23, %c0_24], %35 {strides = array<i32>} : memref<512x128xf32, #tpu.memory_space<vmem>>, vector<512x128xf32>,
    return
  }
  func.func @transform_0(%arg0: i32) -> (i32, i32) {
    %c0_i32 = arith.constant 0 : i32
    %c0_i32_0 = arith.constant 0 : i32
    return %arg0, %c0_i32 : i32, i32
  }
  func.func @transform_1(%arg0: i32) -> (i32, i32) {
    %c0_i32 = arith.constant 0 : i32
    %c0_i32_0 = arith.constant 0 : i32
    %c0_i32_1 = arith.constant 0 : i32
    return %c0_i32, %c0_i32_0 : i32, i32
  }
  func.func @transform_2(%arg0: i32) -> (i32, i32) {
    %c0_i32 = arith.constant 0 : i32
    %c0_i32_0 = arith.constant 0 : i32
    %c0_i32_1 = arith.constant 0 : i32
    return %c0_i32, %c0_i32_0 : i32, i32
  }
  func.func @transform_3(%arg0: i32) -> (i32, i32, i32) {
    %c0_i32 = arith.constant 0 : i32
    %c0_i32_0 = arith.constant 0 : i32
    %c0_i32_1 = arith.constant 0 : i32
    %c0_i32_2 = arith.constant 0 : i32
    return %c0_i32, %c0_i32_0, %c0_i32_1 : i32, i32, i32
  }
  func.func @transform_4(%arg0: i32) -> (i32, i32) {
    %c0_i32 = arith.constant 0 : i32
    %c0_i32_0 = arith.constant 0 : i32
    return %arg0, %c0_i32 : i32, i32
  }
}

</mosaic_0001>

<bundles_post_ra>
// kernel: dim_reduction1_forward.1
= control target key start
LH: loop header
LB: loop body
LE: loop exit
PB: predicated region body
PF: predicated region fallthrough
CT: control target
= control target key end

     0   :  { %9 = vsyncpa [#allocation3], 0  ;;  %s4596_s0 = inlined_call_operand.hbm [shape: f32[512,128], index: 0, kind: input, shape index: {}]   ;;  %s4597_s1 = inlined_call_operand.hbm [shape: bf16[128,128], index: 1, kind: input, shape index: {}]   ;;  %s4598_s2 = inlined_call_operand.vmem [shape: f32[1,128], index: 2, kind: input, shape index: {}]   ;;  %s4599_s3 = inlined_call_operand.hbm [shape: bf16[4,128,128], index: 3, kind: input, shape index: {}]   ;;  %s4600_s4 = inlined_call_operand.hbm [shape: f32[512,128], index: 4, kind: output, shape index: {}]  }
   0x1   :  { %10 = vsyncpa [#allocation6], 0 }
   0x2   :  { %11 = vsyncpa [#allocation4], 0  ;;  %s3444_s15 = smov [#allocation5]  }
   0x3   :  { %s29_s16 = sshll.u32 %s3444_s15, 4  ;;  %s30_s16 = int_to_ptr.vmem [resolvable:$true] %s29_s16 }
   0x4   :  { %s3366_s17 = scalar_lea.vmem %s30_s16, 1024  ;;  %p3371_p1 = scmp.lt.s32.totalorder %s30_s16, %s30_s16 }
   0x5   :  { %p3367_p0 = scmp.ne.s32.totalorder %s30_s16, %s3366_s17  ;;  %p3372_p2 = scmp.lt.s32.totalorder %s3366_s17, %s3366_s17 }
   0x7   :  { %p3373_p3 = por %p3372_p2, %p3371_p1 }
   0x9   :  { %p3374_p4 = pnand %p3373_p3, %p3367_p0 }
   0xb   :  { %3377 = shalt.err (!%p3374_p4)
}
   0xc   :  { %s3445_s18 = smov 64   ;;  %s3446_s19 = smov 4  }
   0xd   :  { %35 = dma.hbm_to_vmem [thread:$0]  %s4597_s1, 1024, %s30_s16, [#allocation6], %s3445_s18, %s3445_s18, %s3446_s19  }
   0xe   :  { %s3447_s22 = smov [#allocation2]  }
   0xf   :  { %s17_s23 = sshll.u32 %s3447_s22, 4  ;;  %s18_s23 = int_to_ptr.vmem [resolvable:$true] %s17_s23 }
  0x10   :  { %s3386_s24 = scalar_lea.vmem %s18_s23, 8192  ;;  %p3391_p6 = scmp.lt.s32.totalorder %s18_s23, %s18_s23 }
  0x11   :  { %p3387_p5 = scmp.ne.s32.totalorder %s18_s23, %s3386_s24  ;;  %p3392_p7 = scmp.lt.s32.totalorder %s3386_s24, %s3386_s24 }
  0x13   :  { %p3393_p8 = por %p3392_p7, %p3391_p6 }
  0x15   :  { %p3394_p9 = pnand %p3393_p8, %p3387_p5 }
  0x17   :  { %3397 = shalt.err (!%p3394_p9)
}
  0x18   :  { %s3448_s25 = smov 128   ;;  %s3449_s26 = smov 8  }
  0x19   :  { %23 = dma.hbm_to_vmem [thread:$0]  %s4596_s0, 8192, %s18_s23, [#allocation3], %s3448_s25, %s3448_s25, %s3449_s26  }
  0x1a   :  { %s3450_s1 = smov [#allocation7]  }
  0x1b   :  { %s43_s29 = sshll.u32 %s3450_s1, 4  ;;  %s44_s29 = int_to_ptr.vmem [resolvable:$true] %s43_s29 }
  0x1c   :  { %s3406_s30 = scalar_lea.vmem %s44_s29, 4096  ;;  %p3411_p11 = scmp.lt.s32.totalorder %s44_s29, %s44_s29 }
  0x1d   :  { %p3407_p10 = scmp.ne.s32.totalorder %s44_s29, %s3406_s30  ;;  %p3412_p12 = scmp.lt.s32.totalorder %s3406_s30, %s3406_s30 }
  0x1f   :  { %p3413_p13 = por %p3412_p12, %p3411_p11 }
  0x21   :  { %p3414_p0 = pnand %p3413_p13, %p3407_p10 }
  0x23   :  { %3417 = shalt.err (!%p3414_p0)
}
  0x24   :  { %49 = dma.hbm_to_vmem [thread:$0]  %s4599_s3, 4096, %s44_s29, [#allocation6], %s3445_s18, %s3445_s18, %s3446_s19  }
  0x25   :  { %3438 = dma.done.wait [#allocation3], 8192  }
  0x26   :  { %3439 = vsyncadd [#allocation3], 4294959104 }
  0x27   :  { %3440 = dma.done.wait [#allocation6], 5120  }
  0x28   :  { %3441 = vsyncadd [#allocation6], 4294962176  ;;  %v3318_v0 = vld [vmem:[#allocation5 + $0x38] sm:$0xff]   ;;  %v3319_v1 = vld [vmem:[#allocation5 + $0x30] sm:$0xff]  }
  0x29   :  { %2894 = vmatprep.subr.bf16.mxu0 %v3318_v0  ;;  %3294 = vmatprep.subr.bf16.mxu1 %v3318_v0  ;;  %v3320_v2 = vld [vmem:[#allocation5 + $0x28] sm:$0xff]   ;;  %v3321_v3 = vld [vmem:[#allocation5 + $0x20] sm:$0xff]   ;;  %v3322_v7 = vld [vmem:[#allocation5 + $0x18] sm:$0xff]  }
  0x2a   :  { %2895 = vmatpush3.bf16.msra.mxu0 %v3318_v0  ;;  %3302 = vmatpush3.bf16.msra.mxu1 %v3318_v0  ;;  %v3489_v4 = vld [vmem:[#allocation2] sm:$0xff]  ;;  %v3491_v5 = vld [vmem:[#allocation2 + $0x8] sm:$0xff]  ;;  %v3323_v8 = vld [vmem:[#allocation5 + $0x10] sm:$0xff]  }
  0x2b   :  { %2896 = vmatprep.subr.bf16.mxu0 %v3319_v1  ;;  %3295 = vmatprep.subr.bf16.mxu1 %v3319_v1  ;;  %v124_v6 = vpack.c.bf16 %v3491_v5, %v3489_v4  ;;  %v3495_v9 = vld [vmem:[#allocation2 + $0x100] sm:$0xff]  ;;  %v3497_v10 = vld [vmem:[#allocation2 + $0x108] sm:$0xff]  ;;  %v3501_v14 = vld [vmem:[#allocation2 + $0x10] sm:$0xff] }
  0x2c   :  { %v3324_v11 = vld [vmem:[#allocation5 + $0x8] sm:$0xff]   ;;  %v140_v12 = vpack.c.bf16 %v3497_v10, %v3495_v9  ;;  %v3325_v13 = vld [vmem:[#allocation5] sm:$0xff]   ;;  %v3503_v15 = vld [vmem:[#allocation2 + $0x18] sm:$0xff] }
  0x2d   :  { %2910 = vmatprep.mubr.bf16.mxu0 %v124_v6  ;;  %v3505_v16 = vld [vmem:[#allocation2 + $0x20] sm:$0xff]  ;;  %v3507_v17 = vld [vmem:[#allocation2 + $0x28] sm:$0xff]  ;;  %v3509_v18 = vld [vmem:[#allocation2 + $0x110] sm:$0xff]  ;;  %v125_v22 = vpack.c.bf16 %v3503_v15, %v3501_v14 }
  0x2e   :  { %2897 = vmatpush3.bf16.msra.mxu0 %v3319_v1  ;;  %3303 = vmatpush3.bf16.msra.mxu1 %v3319_v1  ;;  %v3511_v19 = vld [vmem:[#allocation2 + $0x118] sm:$0xff]  ;;  %v3513_v20 = vld [vmem:[#allocation2 + $0x120] sm:$0xff]  ;;  %v3515_v21 = vld [vmem:[#allocation2 + $0x128] sm:$0xff]  ;;  %v126_v24 = vpack.c.bf16 %v3507_v17, %v3505_v16 }
  0x2f   :  { %2898 = vmatprep.subr.bf16.mxu0 %v3320_v2  ;;  %3296 = vmatprep.subr.bf16.mxu1 %v3320_v2  ;;  %v3326_v23 = vld [vmem:[#allocation7 + $0x38] sm:$0xff]   ;;  %v141_v25 = vpack.c.bf16 %v3511_v19, %v3509_v18  ;;  %v142_v26 = vpack.c.bf16 %v3515_v21, %v3513_v20  ;;  %v3525_v27 = vld [vmem:[#allocation2 + $0x30] sm:$0xff]  ;;  %v3529_v30 = vld [vmem:[#allocation2 + $0x40] sm:$0xff] }
  0x30   :  { %2942 = vmatprep.mubr.bf16.mxu1 %v140_v12  ;;  %v3527_v28 = vld [vmem:[#allocation2 + $0x38] sm:$0xff]  ;;  %v3327_v29 = vld [vmem:[#allocation7 + $0x30] sm:$0xff]   ;;  %v3531_v31 = vld [vmem:[#allocation2 + $0x48] sm:$0xff] }
  0x31   :  { %v3533_v32 = vld [vmem:[#allocation2 + $0x130] sm:$0xff]  ;;  %v3535_v33 = vld [vmem:[#allocation2 + $0x138] sm:$0xff]  ;;  %v3537_v34 = vld [vmem:[#allocation2 + $0x140] sm:$0xff]  ;;  %v127_v37 = vpack.c.bf16 %v3527_v28, %v3525_v27  ;;  %v128_v38 = vpack.c.bf16 %v3531_v31, %v3529_v30 }
  0x32   :  { %2899 = vmatpush3.bf16.msra.mxu0 %v3320_v2  ;;  %3304 = vmatpush3.bf16.msra.mxu1 %v3320_v2  ;;  %4721 = vst [vmem:[#allocation12_spill] sm:$0xff] %v3535_v33  ;;  %v3539_v35 = vld [vmem:[#allocation2 + $0x148] sm:$0xff]  ;;  %v143_v39 = vpack.c.bf16 %v3535_v33, %v3533_v32  ;;  %v3329_v40 = vld [vmem:[#allocation7 + $0x20] sm:$0xff]   ;;  %v3549_v42 = vld [vmem:[#allocation2 + $0x50] sm:$0xff] }
  0x33   :  { %2900 = vmatprep.subr.bf16.mxu0 %v3321_v3  ;;  %3297 = vmatprep.subr.bf16.mxu1 %v3321_v3  ;;  %v3328_v36 = vld [vmem:[#allocation7 + $0x28] sm:$0xff]   ;;  %v144_v41 = vpack.c.bf16 %v3539_v35, %v3537_v34  ;;  %v3551_v43 = vld [vmem:[#allocation2 + $0x58] sm:$0xff]  ;;  %v3553_v44 = vld [vmem:[#allocation2 + $0x60] sm:$0xff] }
  0x34   :  { %v3555_v45 = vld [vmem:[#allocation2 + $0x68] sm:$0xff]  ;;  %v3557_v46 = vld [vmem:[#allocation2 + $0x150] sm:$0xff]  ;;  %v3559_v47 = vld [vmem:[#allocation2 + $0x158] sm:$0xff]  ;;  %v129_v51 = vpack.c.bf16 %v3551_v43, %v3549_v42 }
  0x35   :  { %4722 = vst [vmem:[#allocation13_spill] sm:$0xff] %v3557_v46  ;;  %4723 = vst [vmem:[#allocation14_spill] sm:$0xff] %v3559_v47  ;;  %v3561_v48 = vld [vmem:[#allocation2 + $0x160] sm:$0xff]  ;;  %v3563_v49 = vld [vmem:[#allocation2 + $0x168] sm:$0xff]  ;;  %v130_v52 = vpack.c.bf16 %v3555_v45, %v3553_v44  ;;  %v145_v53 = vpack.c.bf16 %v3559_v47, %v3557_v46 }
  0x36   :  { %2901 = vmatpush3.bf16.msra.mxu0 %v3321_v3  ;;  %3305 = vmatpush3.bf16.msra.mxu1 %v3321_v3  ;;  %4724 = vst [vmem:[#allocation15_spill] sm:$0xff] %v3561_v48  ;;  %4725 = vst [vmem:[#allocation16_spill] sm:$0xff] %v3563_v49  ;;  %v3330_v50 = vld [vmem:[#allocation7 + $0x18] sm:$0xff]   ;;  %v3331_v54 = vld [vmem:[#allocation7 + $0x10] sm:$0xff]   ;;  %v146_v55 = vpack.c.bf16 %v3563_v49, %v3561_v48 }
  0x37   :  { %2902 = vmatprep.subr.bf16.mxu0 %v3322_v7  ;;  %3298 = vmatprep.subr.bf16.mxu1 %v3322_v7  ;;  %v3573_v56 = vld [vmem:[#allocation2 + $0x70] sm:$0xff]  ;;  %v3575_v57 = vld [vmem:[#allocation2 + $0x78] sm:$0xff]  ;;  %v3577_v58 = vld [vmem:[#allocation2 + $0x80] sm:$0xff] }
  0x38   :  { %v3579_v59 = vld [vmem:[#allocation2 + $0x88] sm:$0xff]  ;;  %v3581_v60 = vld [vmem:[#allocation2 + $0x170] sm:$0xff]  ;;  %v3583_v61 = vld [vmem:[#allocation2 + $0x178] sm:$0xff]  ;;  %v131_v1 = vpack.c.bf16 %v3575_v57, %v3573_v56 }
  0x39   :  { %4726 = vst [vmem:[#allocation17_spill] sm:$0xff] %v3581_v60  ;;  %4727 = vst [vmem:[#allocation18_spill] sm:$0xff] %v3583_v61  ;;  %v3585_v62 = vld [vmem:[#allocation2 + $0x180] sm:$0xff]  ;;  %v3587_v63 = vld [vmem:[#allocation2 + $0x188] sm:$0xff]  ;;  %v132_v2 = vpack.c.bf16 %v3579_v59, %v3577_v58  ;;  %v147_v3 = vpack.c.bf16 %v3583_v61, %v3581_v60 }
  0x3a   :  { %2903 = vmatpush3.bf16.msra.mxu0 %v3322_v7  ;;  %3306 = vmatpush3.bf16.msra.mxu1 %v3322_v7  ;;  %4728 = vst [vmem:[#allocation19_spill] sm:$0xff] %v3585_v62  ;;  %4729 = vst [vmem:[#allocation20_spill] sm:$0xff] %v3587_v63  ;;  %v3332_v0 = vld [vmem:[#allocation7 + $0x8] sm:$0xff]   ;;  %v148_v6 = vpack.c.bf16 %v3587_v63, %v3585_v62  ;;  %v3597_v7 = vld [vmem:[#allocation2 + $0x90] sm:$0xff] }
  0x3b   :  { %2904 = vmatprep.subr.bf16.mxu0 %v3323_v8  ;;  %3299 = vmatprep.subr.bf16.mxu1 %v3323_v8  ;;  %v3603_v12 = vld [vmem:[#allocation2 + $0xa8] sm:$0xff]  ;;  %v3334_v60 = vld [vmem:[#allocation7 + $0x78] sm:$0xff]   ;;  %v3335_v63 = vld [vmem:[#allocation7 + $0x70] sm:$0xff]  }
  0x3c   :  { %v3336_v47 = vld [vmem:[#allocation7 + $0x68] sm:$0xff]  }
  0x3e   :  { %2905 = vmatpush3.bf16.msra.mxu0 %v3323_v8  ;;  %3307 = vmatpush3.bf16.msra.mxu1 %v3323_v8  ;;  %v3599_v8 = vld [vmem:[#allocation2 + $0x98] sm:$0xff] }
  0x3f   :  { %2906 = vmatprep.subr.bf16.mxu0 %v3324_v11  ;;  %3300 = vmatprep.subr.bf16.mxu1 %v3324_v11 }
  0x42   :  { %2907 = vmatpush3.bf16.msra.mxu0 %v3324_v11  ;;  %3308 = vmatpush3.bf16.msra.mxu1 %v3324_v11  ;;  %v3601_v11 = vld [vmem:[#allocation2 + $0xa0] sm:$0xff] }
  0x43   :  { %2908 = vmatprep.subr.bf16.mxu0 %v3325_v13  ;;  %3301 = vmatprep.subr.bf16.mxu1 %v3325_v13 }
  0x46   :  { %2909 = vmatpush3.bf16.msra.mxu0 %v3325_v13  ;;  %3309 = vmatpush3.bf16.msra.mxu1 %v3325_v13  ;;  %v3605_v13 = vld [vmem:[#allocation2 + $0x190] sm:$0xff] }
  0x47   :  { %2974 = vmatprep.subr.bf16.mxu1 %v3326_v23  ;;  %4730 = vst [vmem:[#allocation21_spill] sm:$0xff] %v3605_v13  ;;  %3054 = vmatprep.subr.bf16.mxu0 %v3334_v60 }
  0x49   :  { %2911 = vmatmul.mubr.bf16.vlgmr.msra.gmra.mxu0 %v125_v22  ;;  %2943 = vmatmul.mubr.bf16.vlgmr.msra.gmra.mxu1 %v141_v25  ;;  %v3607_v22 = vld [vmem:[#allocation2 + $0x198] sm:$0xff]  ;;  %v133_v25 = vpack.c.bf16 %v3599_v8, %v3597_v7 }
  0x4a   :  { %2914 = vmatprep.mubr.bf16.mxu0 %v126_v24  ;;  %2946 = vmatprep.mubr.bf16.mxu1 %v142_v26  ;;  %4731 = vst [vmem:[#allocation22_spill] sm:$0xff] %v3607_v22  ;;  %v3611_v24 = vld [vmem:[#allocation2 + $0x1a8] sm:$0xff]  ;;  %v134_v26 = vpack.c.bf16 %v3603_v12, %v3601_v11 }
  0x4b   :  { %2975 = vmatpush3.bf16.msra.mxu1 %v3326_v23  ;;  %v3609_v23 = vld [vmem:[#allocation2 + $0x1a0] sm:$0xff]  ;;  %4733 = vst [vmem:[#allocation24_spill] sm:$0xff] %v3611_v24  ;;  %3055 = vmatpush3.bf16.msra.mxu0 %v3334_v60 }
  0x4c   :  { %2976 = vmatprep.subr.bf16.mxu1 %v3327_v29  ;;  %4732 = vst [vmem:[#allocation23_spill] sm:$0xff] %v3609_v23  ;;  %3056 = vmatprep.subr.bf16.mxu0 %v3335_v63 }
  0x4f   :  { %2977 = vmatpush3.bf16.msra.mxu1 %v3327_v29  ;;  %v149_v29 = vpack.c.bf16 %v3607_v22, %v3605_v13  ;;  %3057 = vmatpush3.bf16.msra.mxu0 %v3335_v63 }
  0x50   :  { %2978 = vmatprep.subr.bf16.mxu1 %v3328_v36  ;;  %3058 = vmatprep.subr.bf16.mxu0 %v3336_v47 }
  0x51   :  { %2915 = vmatmul.mubr.bf16.gmra.mxu0 %v127_v37  ;;  %2947 = vmatmul.mubr.bf16.gmra.mxu1 %v143_v39  ;;  %v3621_v37 = vld [vmem:[#allocation2 + $0xb0] sm:$0xff]  ;;  %v3625_v39 = vld [vmem:[#allocation2 + $0xc0] sm:$0xff] }
  0x52   :  { %2918 = vmatprep.mubr.bf16.mxu0 %v128_v38  ;;  %2950 = vmatprep.mubr.bf16.mxu1 %v144_v41  ;;  %v3623_v38 = vld [vmem:[#allocation2 + $0xb8] sm:$0xff]  ;;  %v3629_v41 = vld [vmem:[#allocation2 + $0x1b0] sm:$0xff] }
  0x53   :  { %2979 = vmatpush3.bf16.msra.mxu1 %v3328_v36  ;;  %v150_v36 = vpack.c.bf16 %v3611_v24, %v3609_v23  ;;  %4734 = vst [vmem:[#allocation25_spill] sm:$0xff] %v3629_v41  ;;  %3059 = vmatpush3.bf16.msra.mxu0 %v3336_v47 }
  0x54   :  { %2980 = vmatprep.subr.bf16.mxu1 %v3329_v40 }
  0x57   :  { %2981 = vmatpush3.bf16.msra.mxu1 %v3329_v40  ;;  %v3627_v40 = vld [vmem:[#allocation2 + $0xc8] sm:$0xff] }
  0x58   :  { %2982 = vmatprep.subr.bf16.mxu1 %v3330_v50 }
  0x59   :  { %2919 = vmatmul.mubr.bf16.gmra.mxu0 %v129_v51  ;;  %2951 = vmatmul.mubr.bf16.gmra.mxu1 %v145_v53  ;;  %v3633_v51 = vld [vmem:[#allocation2 + $0x1c0] sm:$0xff]  ;;  %v135_v53 = vpack.c.bf16 %v3623_v38, %v3621_v37 }
  0x5a   :  { %2922 = vmatprep.mubr.bf16.mxu0 %v130_v52  ;;  %2954 = vmatprep.mubr.bf16.mxu1 %v146_v55  ;;  %4736 = vst [vmem:[#allocation27_spill] sm:$0xff] %v3633_v51  ;;  %v3635_v52 = vld [vmem:[#allocation2 + $0x1c8] sm:$0xff] }
  0x5b   :  { %2983 = vmatpush3.bf16.msra.mxu1 %v3330_v50  ;;  %v3631_v50 = vld [vmem:[#allocation2 + $0x1b8] sm:$0xff]  ;;  %4737 = vst [vmem:[#allocation28_spill] sm:$0xff] %v3635_v52 }
  0x5c   :  { %2984 = vmatprep.subr.bf16.mxu1 %v3331_v54  ;;  %4735 = vst [vmem:[#allocation26_spill] sm:$0xff] %v3631_v50  ;;  %v151_v55 = vpack.c.bf16 %v3631_v50, %v3629_v41  ;;  %v3669_v50 = vld [vmem:[#allocation2 + $0xf0] sm:$0xff]  ;;  %v3671_v41 = vld [vmem:[#allocation2 + $0xf8] sm:$0xff] }
  0x5d   :  { %v139_v22 = vpack.c.bf16 %v3671_v41, %v3669_v50 }
  0x5f   :  { %2985 = vmatpush3.bf16.msra.mxu1 %v3331_v54  ;;  %v136_v54 = vpack.c.bf16 %v3627_v40, %v3625_v39 }
  0x60   :  { %2986 = vmatprep.subr.bf16.mxu1 %v3332_v0 }
  0x61   :  { %2923 = vmatmul.mubr.bf16.gmra.mxu0 %v131_v1  ;;  %2955 = vmatmul.mubr.bf16.gmra.mxu1 %v147_v3  ;;  %v3645_v1 = vld [vmem:[#allocation2 + $0xd0] sm:$0xff]  ;;  %v3649_v3 = vld [vmem:[#allocation2 + $0xe0] sm:$0xff] }
  0x62   :  { %2926 = vmatprep.mubr.bf16.mxu0 %v132_v2  ;;  %2958 = vmatprep.mubr.bf16.mxu1 %v148_v6  ;;  %v3647_v2 = vld [vmem:[#allocation2 + $0xd8] sm:$0xff]  ;;  %v3651_v6 = vld [vmem:[#allocation2 + $0xe8] sm:$0xff] }
  0x63   :  { %2987 = vmatpush3.bf16.msra.mxu1 %v3332_v0  ;;  %v152_v0 = vpack.c.bf16 %v3635_v52, %v3633_v51  ;;  %v3673_v52 = vld [vmem:[#allocation2 + $0x1f0] sm:$0xff]  ;;  %v3675_v51 = vld [vmem:[#allocation2 + $0x1f8] sm:$0xff] }
  0x64   :  { %4742 = vst [vmem:[#allocation33_spill] sm:$0xff] %v3673_v52  ;;  %4743 = vst [vmem:[#allocation34_spill] sm:$0xff] %v3675_v51 }
  0x69   :  { %2927 = vmatmul.mubr.bf16.gmra.mxu0 %v133_v25  ;;  %2959 = vmatmul.mubr.bf16.gmra.mxu1 %v149_v29  ;;  %v3653_v25 = vld [vmem:[#allocation2 + $0x1d0] sm:$0xff]  ;;  %v3657_v29 = vld [vmem:[#allocation2 + $0x1e0] sm:$0xff] }
  0x6a   :  { %2930 = vmatprep.mubr.bf16.mxu0 %v134_v26  ;;  %2962 = vmatprep.mubr.bf16.mxu1 %v150_v36  ;;  %4738 = vst [vmem:[#allocation29_spill] sm:$0xff] %v3653_v25  ;;  %v3655_v26 = vld [vmem:[#allocation2 + $0x1d8] sm:$0xff]  ;;  %4740 = vst [vmem:[#allocation31_spill] sm:$0xff] %v3657_v29  ;;  %v3659_v36 = vld [vmem:[#allocation2 + $0x1e8] sm:$0xff] }
  0x6b   :  { %4739 = vst [vmem:[#allocation30_spill] sm:$0xff] %v3655_v26  ;;  %4741 = vst [vmem:[#allocation32_spill] sm:$0xff] %v3659_v36 }
  0x71   :  { %2931 = vmatmul.mubr.bf16.gmra.mxu0 %v135_v53  ;;  %2963 = vmatmul.mubr.bf16.gmra.mxu1 %v151_v55  ;;  %v137_v53 = vpack.c.bf16 %v3647_v2, %v3645_v1  ;;  %v153_v55 = vpack.c.bf16 %v3655_v26, %v3653_v25  ;;  %v155_v26 = vpack.c.bf16 %v3675_v51, %v3673_v52 }
  0x72   :  { %2934 = vmatprep.mubr.bf16.mxu0 %v136_v54  ;;  %2966 = vmatprep.mubr.bf16.mxu1 %v152_v0  ;;  %v138_v54 = vpack.c.bf16 %v3651_v6, %v3649_v3  ;;  %v154_v0 = vpack.c.bf16 %v3659_v36, %v3657_v29 }
  0x79   :  { %2935 = vmatmul.mubr.bf16.gmra.mxu0 %v137_v53  ;;  %2967 = vmatmul.mubr.bf16.gmra.mxu1 %v153_v55  ;;  %v3333_v53 = vld [vmem:[#allocation7] sm:$0xff]  }
  0x7a   :  { %2938 = vmatprep.mubr.bf16.mxu0 %v138_v54  ;;  %2970 = vmatprep.mubr.bf16.mxu1 %v154_v0  ;;  %v3684_v55 = vld [vmem:[%s4598_s2] ss:$0 sm:$0xff]  ;;  %s3451_s2 = smov [#allocation8]  }
  0x7b   :  { %2988 = vmatprep.subr.bf16.mxu1 %v3333_v53  ;;  %s2640_s7 = sshll.u32 %s3451_s2, 4  ;;  %s2641_s7 = int_to_ptr.vmem [resolvable:$true] %s2640_s7 }
  0x7c   :  { %2989 = vmatpush3.bf16.msra.mxu1 %v3333_v53  ;;  %s3418_s8 = scalar_lea.vmem %s2641_s7, 8192  ;;  %p3423_p2 = scmp.lt.s32.totalorder %s2641_s7, %s2641_s7 }
  0x7d   :  { %p3419_p1 = scmp.ne.s32.totalorder %s2641_s7, %s3418_s8  ;;  %p3424_p3 = scmp.lt.s32.totalorder %s3418_s8, %s3418_s8 }
  0x7f   :  { %p3425_p4 = por %p3424_p3, %p3423_p2 }
  0x81   :  { %2939 = vmatmul.mubr.bf16.gmra.mxu0 %v139_v22  ;;  %2971 = vmatmul.mubr.bf16.gmra.mxu1 %v155_v26  ;;  %p3426_p5 = pnand %p3425_p4, %p3419_p1 }
 0x109   :  { %v2912_v54 = vpop.f32.mrf.mxu0  ;;  %v3686_v0 = vpop.f32.mrf.mxu1 }
 0x10a   :  { %v270_v51 = vadd.f32 %v2912_v54, %v3684_v55 }
 0x10b   :  { %v261_v25 = vpop.f32.mrf.mxu0  ;;  %v3689_v29 = vpop.f32.mrf.mxu1 }
 0x10c   :  { %v262_v36 = vadd.f32 %v3684_v55, %v261_v25  ;;  %v3705_v25 = vadd.f32 %v270_v51, %v3501_v14 }
 0x10d   :  { %v2913_v22 = vpop.f32.mrf.mxu0  ;;  %v3693_v52 = vpop.f32.mrf.mxu1 }
 0x10e   :  { %v273_v26 = vadd.f32 %v2913_v22, %v3684_v55  ;;  %v3696_v13 = vadd.f32 %v262_v36, %v3489_v4  ;;  %4745 = vst [vmem:[#allocation36_spill] sm:$0xff] %v3705_v25  ;;  %v4627_v51 = vmax.f32 %v3705_v25, 0.0 }
 0x10f   :  { %v264_v53 = vpop.f32.mrf.mxu0  ;;  %v3702_v61 = vpop.f32.mrf.mxu1 }
 0x110   :  { %4744 = vst [vmem:[#allocation35_spill] sm:$0xff] %v3696_v13  ;;  %v3699_v24 = vadd.f32 %v273_v26, %v3503_v15  ;;  %v265_v23 = vadd.f32 %v3684_v55, %v264_v53  ;;  %v4626_v15 = vmax.f32 %v3696_v13, 0.0 }
 0x111   :  { %v2916_v54 = vpop.f32.mrf.mxu0  ;;  %v3710_v62 = vpop.f32.mrf.mxu1 }
 0x112   :  { %v3708_v22 = vadd.f32 %v265_v23, %v3491_v5  ;;  %v286_v5 = vadd.f32 %v2916_v54, %v3684_v55  ;;  %v4747_v60 = vmax.f32 %v3699_v24, 0.0 }
 0x113   :  { %v277_v36 = vpop.f32.mrf.mxu0  ;;  %v3716_v14 = vpop.f32.mrf.mxu1 }
 0x114   :  { %4746 = vst [vmem:[#allocation37_spill] sm:$0xff] %v3708_v22  ;;  %v4625_v26 = vmax.f32 %v3708_v22, 0.0  ;;  %v278_v53 = vadd.f32 %v3684_v55, %v277_v36  ;;  %v678_v36 = vpack.c.bf16 %v4747_v60, %v4627_v51  ;;  %v3337_v60 = vld [vmem:[#allocation7 + $0x60] sm:$0xff]  }
 0x115   :  { %v2917_v23 = vpop.f32.mrf.mxu0  ;;  %v3725_v49 = vpop.f32.mrf.mxu1  ;;  %3060 = vmatprep.subr.bf16.mxu0 %v3337_v60 }
 0x116   :  { %v289_v4 = vadd.f32 %v2917_v23, %v3684_v55  ;;  %v677_v46 = vpack.c.bf16 %v4625_v26, %v4626_v15  ;;  %v3732_v54 = vadd.f32 %v278_v53, %v3505_v16  ;;  %v3741_v26 = vadd.f32 %v286_v5, %v3525_v27  ;;  %3061 = vmatpush3.bf16.msra.mxu0 %v3337_v60 }
 0x117   :  { %v280_v48 = vpop.f32.mrf.mxu0  ;;  %v3738_v13 = vpop.f32.mrf.mxu1 }
 0x118   :  { %v3735_v33 = vadd.f32 %v289_v4, %v3527_v28  ;;  %v281_v23 = vadd.f32 %v3684_v55, %v280_v48  ;;  %2990 = vmatprep.mubr.bf16.mxu1 %v677_v46  ;;  %4748 = vst [vmem:[#allocation38_spill] sm:$0xff] %v3741_v26  ;;  %v4631_v46 = vmax.f32 %v3732_v54, 0.0  ;;  %v4633_v27 = vmax.f32 %v3741_v26, 0.0  ;;  %v3339_v26 = vld [vmem:[#allocation7 + $0x50] sm:$0xff]  }
 0x119   :  { %v2920_v15 = vpop.f32.mrf.mxu0  ;;  %2991 = vmatmul.mubr.bf16.vlgmr.msra.gmra.mxu1 %v678_v36  ;;  %v3747_v4 = vpop.f32.mrf.mxu1 }
 0x11a   :  { %v3744_v51 = vadd.f32 %v281_v23, %v3507_v17  ;;  %v302_v53 = vadd.f32 %v2920_v15, %v3684_v55  ;;  %v3338_v17 = vld [vmem:[#allocation7 + $0x58] sm:$0xff]  }
 0x11b   :  { %v293_v28 = vpop.f32.mrf.mxu0  ;;  %v3763_v25 = vpop.f32.mrf.mxu1  ;;  %3062 = vmatprep.subr.bf16.mxu0 %v3338_v17 }
 0x11c   :  { %4749 = vst [vmem:[#allocation39_spill] sm:$0xff] %v3744_v51  ;;  %v4630_v48 = vmax.f32 %v3744_v51, 0.0  ;;  %v294_v63 = vadd.f32 %v3684_v55, %v293_v28  ;;  %v4750_v28 = vmax.f32 %v3735_v33, 0.0  ;;  %3063 = vmatpush3.bf16.msra.mxu0 %v3338_v17 }
 0x11d   :  { %v2921_v5 = vpop.f32.mrf.mxu0  ;;  %3064 = vmatprep.subr.bf16.mxu0 %v3339_v26 }
 0x11e   :  { %v305_v36 = vadd.f32 %v2921_v5, %v3684_v55  ;;  %v679_v23 = vpack.c.bf16 %v4630_v48, %v4631_v46  ;;  %v680_v47 = vpack.c.bf16 %v4750_v28, %v4633_v27  ;;  %v3766_v15 = vadd.f32 %v294_v63, %v3529_v30  ;;  %v3779_v27 = vpop.f32.mrf.mxu1 }
 0x11f   :  { %v296_v16 = vpop.f32.mrf.mxu0  ;;  %v3773_v48 = vadd.f32 %v302_v53, %v3549_v42 }
 0x120   :  { %v3769_v22 = vadd.f32 %v305_v36, %v3551_v43  ;;  %v297_v5 = vadd.f32 %v3684_v55, %v296_v16  ;;  %2994 = vmatprep.mubr.bf16.mxu1 %v679_v23  ;;  %v4636_v43 = vmax.f32 %v3766_v15, 0.0  ;;  %3065 = vmatpush3.bf16.msra.mxu0 %v3339_v26 }
 0x121   :  { %v2924_v46 = vpop.f32.mrf.mxu0  ;;  %2995 = vmatmul.mubr.bf16.gmra.mxu1 %v680_v47  ;;  %v4637_v42 = vmax.f32 %v3773_v48, 0.0 }
 0x122   :  { %v3776_v28 = vadd.f32 %v297_v5, %v3531_v31  ;;  %v4638_v30 = vmax.f32 %v3769_v22, 0.0  ;;  %v318_v53 = vadd.f32 %v2924_v46, %v3684_v55  ;;  %v3340_v31 = vld [vmem:[#allocation7 + $0x48] sm:$0xff]  }
 0x123   :  { %v309_v63 = vpop.f32.mrf.mxu0  ;;  %3066 = vmatprep.subr.bf16.mxu0 %v3340_v31 }
 0x124   :  { %v4635_v16 = vmax.f32 %v3776_v28, 0.0  ;;  %v310_v60 = vadd.f32 %v3684_v55, %v309_v63  ;;  %v682_v17 = vpack.c.bf16 %v4638_v30, %v4637_v42  ;;  %v3795_v63 = vpop.f32.mrf.mxu1  ;;  %3067 = vmatpush3.bf16.msra.mxu0 %v3340_v31 }
 0x125   :  { %v2925_v36 = vpop.f32.mrf.mxu0 }
 0x126   :  { %v321_v23 = vadd.f32 %v2925_v36, %v3684_v55  ;;  %v681_v47 = vpack.c.bf16 %v4635_v16, %v4636_v43  ;;  %v3798_v46 = vadd.f32 %v310_v60, %v3553_v44  ;;  %v3805_v16 = vadd.f32 %v318_v53, %v3573_v56  ;;  %v3811_v60 = vpop.f32.mrf.mxu1 }
 0x127   :  { %v312_v5 = vpop.f32.mrf.mxu0 }
 0x128   :  { %v3801_v51 = vadd.f32 %v321_v23, %v3575_v57  ;;  %v313_v36 = vadd.f32 %v3684_v55, %v312_v5  ;;  %2998 = vmatprep.mubr.bf16.mxu1 %v681_v47  ;;  %4751 = vst [vmem:[#allocation40_spill] sm:$0xff] %v3805_v16  ;;  %v4641_v57 = vmax.f32 %v3798_v46, 0.0  ;;  %v4642_v56 = vmax.f32 %v3805_v16, 0.0 }
 0x129   :  { %v2928_v43 = vpop.f32.mrf.mxu0  ;;  %2999 = vmatmul.mubr.bf16.gmra.mxu1 %v682_v17 }
 0x12a   :  { %v3808_v42 = vadd.f32 %v313_v36, %v3555_v45  ;;  %v4643_v30 = vmax.f32 %v3801_v51, 0.0  ;;  %v334_v53 = vadd.f32 %v2928_v43, %v3684_v55 }
 0x12b   :  { %v325_v44 = vpop.f32.mrf.mxu0 }
 0x12c   :  { %4752 = vst [vmem:[#allocation41_spill] sm:$0xff] %v3808_v42  ;;  %v4640_v23 = vmax.f32 %v3808_v42, 0.0  ;;  %v326_v26 = vadd.f32 %v3684_v55, %v325_v44  ;;  %v684_v36 = vpack.c.bf16 %v4643_v30, %v4642_v56  ;;  %v3827_v44 = vpop.f32.mrf.mxu1  ;;  %v3837_v42 = vadd.f32 %v334_v53, %v3597_v7 }
 0x12d   :  { %v2929_v47 = vpop.f32.mrf.mxu0 }
 0x12e   :  { %v337_v45 = vadd.f32 %v2929_v47, %v3684_v55  ;;  %v683_v5 = vpack.c.bf16 %v4640_v23, %v4641_v57  ;;  %v3830_v31 = vadd.f32 %v326_v26, %v3577_v58  ;;  %4753 = vst [vmem:[#allocation42_spill] sm:$0xff] %v3837_v42  ;;  %v3843_v16 = vpop.f32.mrf.mxu1 }
 0x12f   :  { %v328_v17 = vpop.f32.mrf.mxu0 }
 0x130   :  { %v3833_v43 = vadd.f32 %v337_v45, %v3599_v8  ;;  %v329_v47 = vadd.f32 %v3684_v55, %v328_v17  ;;  %3002 = vmatprep.mubr.bf16.mxu1 %v683_v5  ;;  %v4647_v58 = vmax.f32 %v3830_v31, 0.0  ;;  %v4648_v45 = vmax.f32 %v3837_v42, 0.0 }
 0x131   :  { %v2932_v23 = vpop.f32.mrf.mxu0  ;;  %3003 = vmatmul.mubr.bf16.gmra.mxu1 %v684_v36 }
 0x132   :  { %v3840_v57 = vadd.f32 %v329_v47, %v3579_v59  ;;  %v4649_v56 = vmax.f32 %v3833_v43, 0.0  ;;  %v350_v7 = vadd.f32 %v2932_v23, %v3684_v55  ;;  %v3859_v47 = vpop.f32.mrf.mxu1 }
 0x133   :  { %v341_v30 = vpop.f32.mrf.mxu0 }
 0x134   :  { %4754 = vst [vmem:[#allocation43_spill] sm:$0xff] %v3840_v57  ;;  %v4646_v8 = vmax.f32 %v3840_v57, 0.0  ;;  %v342_v26 = vadd.f32 %v3684_v55, %v341_v30  ;;  %v686_v36 = vpack.c.bf16 %v4649_v56, %v4648_v45  ;;  %v3869_v57 = vadd.f32 %v350_v7, %v3621_v37  ;;  %v3875_v42 = vpop.f32.mrf.mxu1 }
 0x135   :  { %v2933_v53 = vpop.f32.mrf.mxu0 }
 0x136   :  { %v353_v5 = vadd.f32 %v2933_v53, %v3684_v55  ;;  %v685_v59 = vpack.c.bf16 %v4646_v8, %v4647_v58  ;;  %v3862_v30 = vadd.f32 %v342_v26, %v3601_v11  ;;  %4755 = vst [vmem:[#allocation44_spill] sm:$0xff] %v3869_v57 }
 0x137   :  { %v344_v17 = vpop.f32.mrf.mxu0 }
 0x138   :  { %v3865_v23 = vadd.f32 %v353_v5, %v3623_v38  ;;  %v345_v53 = vadd.f32 %v3684_v55, %v344_v17  ;;  %3006 = vmatprep.mubr.bf16.mxu1 %v685_v59  ;;  %v4653_v11 = vmax.f32 %v3862_v30, 0.0  ;;  %v4654_v5 = vmax.f32 %v3869_v57, 0.0 }
 0x139   :  { %v2936_v8 = vpop.f32.mrf.mxu0  ;;  %3007 = vmatmul.mubr.bf16.gmra.mxu1 %v686_v36 }
 0x13a   :  { %v3872_v58 = vadd.f32 %v345_v53, %v3603_v12  ;;  %v4655_v45 = vmax.f32 %v3865_v23, 0.0  ;;  %v366_v37 = vadd.f32 %v2936_v8, %v3684_v55  ;;  %v3891_v53 = vpop.f32.mrf.mxu1 }
 0x13b   :  { %v357_v56 = vpop.f32.mrf.mxu0 }
 0x13c   :  { %4756 = vst [vmem:[#allocation45_spill] sm:$0xff] %v3872_v58  ;;  %v4652_v38 = vmax.f32 %v3872_v58, 0.0  ;;  %v358_v26 = vadd.f32 %v3684_v55, %v357_v56  ;;  %v688_v36 = vpack.c.bf16 %v4655_v45, %v4654_v5  ;;  %v3901_v58 = vadd.f32 %v366_v37, %v3645_v1 }
 0x13d   :  { %v2937_v7 = vpop.f32.mrf.mxu0 }
 0x13e   :  { %v369_v59 = vadd.f32 %v2937_v7, %v3684_v55  ;;  %v687_v12 = vpack.c.bf16 %v4652_v38, %v4653_v11  ;;  %v3894_v56 = vadd.f32 %v358_v26, %v3625_v39  ;;  %v390_v11 = vadd.f32 %v3684_v55, %v3689_v29 }
 0x13f   :  { %v360_v17 = vpop.f32.mrf.mxu0  ;;  %v393_v39 = vadd.f32 %v3684_v55, %v3702_v61 }
 0x140   :  { %v3897_v8 = vadd.f32 %v369_v59, %v3647_v2  ;;  %v361_v7 = vadd.f32 %v3684_v55, %v360_v17  ;;  %3010 = vmatprep.mubr.bf16.mxu1 %v687_v12  ;;  %v3911_v59 = vpop.f32.mrf.mxu1  ;;  %v4677_v12 = vmax.f32 %v3894_v56, 0.0  ;;  %v4672_v17 = vmax.f32 %v3901_v58, 0.0 }
 0x141   :  { %v2940_v38 = vpop.f32.mrf.mxu0  ;;  %3011 = vmatmul.mubr.bf16.gmra.mxu1 %v688_v36  ;;  %v3919_v36 = vadd.f32 %v390_v11, %v3495_v9  ;;  %v3927_v45 = vadd.f32 %v393_v39, %v3497_v10 }
 0x142   :  { %v3906_v5 = vadd.f32 %v361_v7, %v3627_v40  ;;  %v382_v29 = vadd.f32 %v2940_v38, %v3684_v55  ;;  %v3933_v57 = vpop.f32.mrf.mxu1 }
 0x143   :  { %v373_v26 = vpop.f32.mrf.mxu0  ;;  %v4659_v39 = vmax.f32 %v3919_v36, 0.0 }
 0x144   :  { %v4657_v1 = vmax.f32 %v3906_v5, 0.0  ;;  %v374_v37 = vadd.f32 %v3684_v55, %v373_v26  ;;  %v4757_v26 = vmax.f32 %v3897_v8, 0.0  ;;  %v3943_v10 = vadd.f32 %v382_v29, %v3669_v50  ;;  %v3959_v29 = vpop.f32.mrf.mxu1 }
 0x145   :  { %v2941_v40 = vpop.f32.mrf.mxu0 }
 0x146   :  { %v385_v61 = vadd.f32 %v2941_v40, %v3684_v55  ;;  %v689_v7 = vpack.c.bf16 %v4657_v1, %v4677_v12  ;;  %v690_v38 = vpack.c.bf16 %v4757_v26, %v4672_v17  ;;  %v3936_v9 = vadd.f32 %v374_v37, %v3649_v3  ;;  %v4768_v17 = vld [vmem:[#allocation18_spill] sm:$0xff] }
 0x147   :  { %v376_v2 = vpop.f32.mrf.mxu0  ;;  %v4658_v26 = vmax.f32 %v3927_v45, 0.0  ;;  %v406_v3 = vadd.f32 %v3684_v55, %v3716_v14  ;;  %v401_v37 = vadd.f32 %v3693_v52, %v3684_v55 }
 0x148   :  { %v3939_v11 = vadd.f32 %v385_v61, %v3671_v41  ;;  %v377_v40 = vadd.f32 %v3684_v55, %v376_v2  ;;  %3014 = vmatprep.mubr.bf16.mxu1 %v689_v7  ;;  %v409_v41 = vadd.f32 %v3684_v55, %v3738_v13  ;;  %v398_v2 = vadd.f32 %v3686_v0, %v3684_v55 }
 0x149   :  { %3015 = vmatmul.mubr.bf16.gmra.mxu1 %v690_v38  ;;  %v4660_v7 = vmax.f32 %v3943_v10, 0.0  ;;  %v3965_v14 = vadd.f32 %v406_v3, %v3513_v20  ;;  %v693_v52 = vpack.c.bf16 %v4658_v26, %v4659_v39  ;;  %v3988_v3 = vpop.f32.mrf.mxu1  ;;  %v414_v26 = vadd.f32 %v3710_v62, %v3684_v55  ;;  %v4758_v62 = vld [vmem:[#allocation12_spill] sm:$0xff] }
 0x14a   :  { %v3947_v1 = vadd.f32 %v377_v40, %v3651_v6  ;;  %v4671_v50 = vmax.f32 %v3939_v11, 0.0  ;;  %v4666_v6 = vmax.f32 %v3936_v9, 0.0  ;;  %v3972_v0 = vadd.f32 %v409_v41, %v3515_v21 }
 0x14b   :  { %v3979_v38 = vadd.f32 %v398_v2, %v3509_v18  ;;  %v3982_v40 = vadd.f32 %v401_v37, %v3511_v19  ;;  %v4662_v21 = vmax.f32 %v3965_v14, 0.0  ;;  %v422_v18 = vadd.f32 %v3684_v55, %v3763_v25 }
 0x14c   :  { %v4665_v61 = vmax.f32 %v3947_v1, 0.0  ;;  %v692_v20 = vpack.c.bf16 %v4671_v50, %v4660_v7  ;;  %v4661_v41 = vmax.f32 %v3972_v0, 0.0  ;;  %v425_v19 = vadd.f32 %v3684_v55, %v3795_v63 }
 0x14d   :  { %v4663_v2 = vmax.f32 %v3979_v38, 0.0  ;;  %v4664_v37 = vmax.f32 %v3982_v40, 0.0  ;;  %v4015_v39 = vadd.f32 %v414_v26, %v3533_v32  ;;  %v441_v32 = vadd.f32 %v3684_v55, %v3859_v47 }
 0x14e   :  { %v691_v13 = vpack.c.bf16 %v4665_v61, %v4666_v6  ;;  %v4008_v25 = vadd.f32 %v425_v19, %v3539_v35  ;;  %v695_v63 = vpack.c.bf16 %v4661_v41, %v4662_v21  ;;  %v438_v19 = vadd.f32 %v3684_v55, %v3827_v44  ;;  %v3341_v21 = vld [vmem:[#allocation7 + $0x40] sm:$0xff]   ;;  %v4761_v61 = vld [vmem:[#allocation13_spill] sm:$0xff]  ;;  %v4762_v6 = vld [vmem:[#allocation14_spill] sm:$0xff] }
 0x14f   :  { %v4669_v26 = vmax.f32 %v4015_v39, 0.0  ;;  %v4760_v44 = vld [vmem:[#allocation16_spill] sm:$0xff]  ;;  %3068 = vmatprep.subr.bf16.mxu0 %v3341_v21 }
 0x150   :  { %3018 = vmatprep.mubr.bf16.mxu1 %v691_v13  ;;  %v417_v13 = vadd.f32 %v3725_v49, %v3684_v55  ;;  %3069 = vmatpush3.bf16.msra.mxu0 %v3341_v21  ;;  %v449_v21 = vadd.f32 %v3843_v16, %v3684_v55 }
 0x151   :  { %3019 = vmatmul.mubr.bf16.gmra.mxu1 %v692_v20  ;;  %v4002_v20 = vpop.f32.mrf.mxu1 }
 0x152   :  { %3022 = vmatprep.mubr.bf16.mxu1 %v693_v52  ;;  %v4005_v52 = vadd.f32 %v422_v18, %v3537_v34  ;;  %v4018_v7 = vadd.f32 %v417_v13, %v4758_v62  ;;  %v694_v34 = vpack.c.bf16 %v4664_v37, %v4663_v2  ;;  %v4667_v18 = vmax.f32 %v4008_v25, 0.0 }
 0x153   :  { %v472_v49 = vpop.f32.mrf.mxu1  ;;  %v430_v62 = vadd.f32 %v3747_v4, %v3684_v55  ;;  %v4042_v37 = vadd.f32 %v441_v32, %v4760_v44 }
 0x154   :  { %v4668_v35 = vmax.f32 %v4005_v52, 0.0  ;;  %v4670_v13 = vmax.f32 %v4018_v7, 0.0 }
 0x155   :  { %v4036_v41 = vpop.f32.mrf.mxu1  ;;  %v4049_v4 = vadd.f32 %v430_v62, %v4761_v61  ;;  %v4673_v44 = vmax.f32 %v4042_v37, 0.0  ;;  %v454_v61 = vadd.f32 %v3684_v55, %v3891_v53  ;;  %v4767_v53 = vld [vmem:[#allocation17_spill] sm:$0xff] }
 0x156   :  { %v697_v47 = vpack.c.bf16 %v4667_v18, %v4668_v35  ;;  %v446_v18 = vadd.f32 %v3811_v60, %v3684_v55  ;;  %v4763_v35 = vld [vmem:[#allocation19_spill] sm:$0xff]  ;;  %v4084_v60 = vadd.f32 %v449_v21, %v4768_v17  ;;  %v4773_v21 = vld [vmem:[#allocation22_spill] sm:$0xff] }
 0x157   :  { %v4675_v62 = vmax.f32 %v4049_v4, 0.0 }
 0x158   :  { %v4081_v50 = vadd.f32 %v446_v18, %v4767_v53  ;;  %v473_v18 = vadd.f32 %v3684_v55, %v472_v49  ;;  %v462_v53 = vadd.f32 %v3875_v42, %v3684_v55  ;;  %v4772_v49 = vld [vmem:[#allocation21_spill] sm:$0xff] }
 0x159   :  { %3023 = vmatmul.mubr.bf16.gmra.mxu1 %v694_v34  ;;  %v433_v34 = vadd.f32 %v3779_v27, %v3684_v55 }
 0x15a   :  { %3026 = vmatprep.mubr.bf16.mxu1 %v695_v63  ;;  %v4759_v63 = vld [vmem:[#allocation15_spill] sm:$0xff]  ;;  %v4680_v17 = vmax.f32 %v4081_v50, 0.0  ;;  %v4112_v12 = vadd.f32 %v462_v53, %v4772_v49  ;;  %v4780_v49 = vld [vmem:[#allocation25_spill] sm:$0xff] }
 0x15b   :  { %v4039_v2 = vadd.f32 %v438_v19, %v4759_v63  ;;  %v4052_v27 = vadd.f32 %v433_v34, %v4762_v6  ;;  %v696_v19 = vpack.c.bf16 %v4670_v13, %v4669_v26  ;;  %v485_v63 = vpop.f32.mrf.mxu1  ;;  %v457_v6 = vadd.f32 %v3684_v55, %v3933_v57 }
 0x15c   :  { %v4071_v26 = vadd.f32 %v454_v61, %v4763_v35 }
 0x15d   :  { %v4674_v32 = vmax.f32 %v4039_v2, 0.0  ;;  %v4676_v34 = vmax.f32 %v4052_v27, 0.0 }
 0x15e   :  { %4764 = vst [vmem:[#allocation12_spill] sm:$0xff] %v4071_v26  ;;  %v4679_v61 = vmax.f32 %v4071_v26, 0.0 }
 0x15f   :  { %v699_v57 = vpack.c.bf16 %v4673_v44, %v4674_v32  ;;  %v698_v16 = vpack.c.bf16 %v4676_v34, %v4675_v62  ;;  %v4769_v32 = vld [vmem:[#allocation23_spill] sm:$0xff] }
 0x161   :  { %3027 = vmatmul.mubr.bf16.gmra.mxu1 %v696_v19  ;;  %v2969_v19 = vpop.f32.mrf.mxu1 }
 0x162   :  { %3030 = vmatprep.mubr.bf16.mxu1 %v697_v47  ;;  %v4765_v47 = vld [vmem:[#allocation20_spill] sm:$0xff] }
 0x163   :  { %v4074_v13 = vadd.f32 %v457_v6, %v4765_v47  ;;  %v488_v35 = vpop.f32.mrf.mxu1  ;;  %v470_v47 = vadd.f32 %v3684_v55, %v3988_v3 }
 0x164   :  { %v489_v53 = vadd.f32 %v3684_v55, %v488_v35 }
 0x165   :  { %4766 = vst [vmem:[#allocation15_spill] sm:$0xff] %v4074_v13  ;;  %v4678_v6 = vmax.f32 %v4074_v13, 0.0  ;;  %v2972_v44 = vpop.f32.mrf.mxu1  ;;  %v4102_v62 = vadd.f32 %v470_v47, %v4769_v32  ;;  %v4781_v13 = vld [vmem:[#allocation26_spill] sm:$0xff] }
 0x167   :  { %v701_v3 = vpack.c.bf16 %v4678_v6, %v4679_v61  ;;  %v501_v47 = vpop.f32.mrf.mxu1  ;;  %v486_v6 = vadd.f32 %v3684_v55, %v485_v63  ;;  %v4775_v61 = vld [vmem:[#allocation27_spill] sm:$0xff] }
 0x169   :  { %3031 = vmatmul.mubr.bf16.gmra.mxu1 %v698_v16  ;;  %v465_v16 = vadd.f32 %v3911_v59, %v3684_v55  ;;  %v4774_v59 = vmax.f32 %v4084_v60, 0.0 }
 0x16a   :  { %3034 = vmatprep.mubr.bf16.mxu1 %v699_v57  ;;  %v4770_v57 = vld [vmem:[#allocation24_spill] sm:$0xff] }
 0x16b   :  { %v4105_v34 = vadd.f32 %v473_v18, %v4770_v57  ;;  %v4115_v42 = vadd.f32 %v465_v16, %v4773_v21  ;;  %v700_v32 = vpack.c.bf16 %v4774_v59, %v4680_v17  ;;  %v4683_v18 = vmax.f32 %v4102_v62, 0.0  ;;  %v4777_v57 = vld [vmem:[#allocation28_spill] sm:$0xff] }
 0x16c   :  { %v478_v16 = vadd.f32 %v3959_v29, %v3684_v55  ;;  %v481_v59 = vadd.f32 %v4002_v20, %v3684_v55  ;;  %v4132_v17 = vadd.f32 %v486_v6, %v4775_v61  ;;  %v4782_v20 = vmax.f32 %v4112_v12, 0.0 }
 0x16d   :  { %4771 = vst [vmem:[#allocation16_spill] sm:$0xff] %v4105_v34  ;;  %v4779_v63 = vmax.f32 %v4105_v34, 0.0  ;;  %v4783_v26 = vmax.f32 %v4115_v42, 0.0 }
 0x16e   :  { %4776 = vst [vmem:[#allocation13_spill] sm:$0xff] %v4132_v17  ;;  %v4142_v21 = vadd.f32 %v478_v16, %v4780_v49  ;;  %v4145_v29 = vadd.f32 %v481_v59, %v4781_v13  ;;  %v494_v59 = vadd.f32 %v4036_v41, %v3684_v55  ;;  %v4791_v13 = vld [vmem:[#allocation30_spill] sm:$0xff] }
 0x16f   :  { %v703_v35 = vpack.c.bf16 %v4779_v63, %v4683_v18  ;;  %v702_v61 = vpack.c.bf16 %v4783_v26, %v4782_v20  ;;  %v502_v63 = vadd.f32 %v3684_v55, %v501_v47  ;;  %v497_v26 = vadd.f32 %v2969_v19, %v3684_v55  ;;  %v4784_v20 = vld [vmem:[#allocation31_spill] sm:$0xff]  ;;  %v4786_v18 = vld [vmem:[#allocation32_spill] sm:$0xff] }
 0x170   :  { %v4793_v41 = vmax.f32 %v4142_v21, 0.0  ;;  %v4794_v19 = vmax.f32 %v4145_v29, 0.0 }
 0x171   :  { %3035 = vmatmul.mubr.bf16.gmra.mxu1 %v700_v32  ;;  %v2973_v32 = vpop.f32.mrf.mxu1  ;;  %v4174_v34 = vadd.f32 %v497_v26, %v4791_v13 }
 0x172   :  { %3038 = vmatprep.mubr.bf16.mxu1 %v701_v3  ;;  %v4135_v3 = vadd.f32 %v489_v53, %v4777_v57  ;;  %v513_v13 = vadd.f32 %v2973_v32, %v3684_v55 }
 0x173   :  { %v504_v6 = vpop.f32.mrf.mxu1  ;;  %4792 = vst [vmem:[#allocation18_spill] sm:$0xff] %v4174_v34 }
 0x174   :  { %4778 = vst [vmem:[#allocation14_spill] sm:$0xff] %v4135_v3  ;;  %v4688_v53 = vmax.f32 %v4135_v3, 0.0  ;;  %v505_v49 = vadd.f32 %v3684_v55, %v504_v6  ;;  %v4789_v6 = vld [vmem:[#allocation29_spill] sm:$0xff] }
 0x175   :  { %v4171_v16 = vadd.f32 %v494_v59, %v4789_v6  ;;  %v510_v59 = vadd.f32 %v2972_v44, %v3684_v55  ;;  %v4795_v6 = vld [vmem:[#allocation33_spill] sm:$0xff] }
 0x176   :  { %v4164_v57 = vadd.f32 %v505_v49, %v4786_v18 }
 0x177   :  { %4790 = vst [vmem:[#allocation17_spill] sm:$0xff] %v4171_v16 }
 0x178   :  { %4787 = vst [vmem:[#allocation20_spill] sm:$0xff] %v4164_v57  ;;  %v4685_v49 = vmax.f32 %v4164_v57, 0.0 }
 0x179   :  { %3039 = vmatmul.mubr.bf16.gmra.mxu1 %v702_v61  ;;  %v4161_v61 = vadd.f32 %v502_v63, %v4784_v20  ;;  %v704_v63 = vpack.c.bf16 %v4794_v19, %v4793_v41  ;;  %v4687_v20 = vmax.f32 %v4171_v16, 0.0  ;;  %v4191_v41 = vadd.f32 %v510_v59, %v4795_v6  ;;  %v4797_v19 = vld [vmem:[#allocation34_spill] sm:$0xff]  ;;  %v3342_v59 = vld [vmem:[#allocation7 + $0xb8] sm:$0xff]   ;;  %v3344_v6 = vld [vmem:[#allocation7 + $0xa8] sm:$0xff]  }
 0x17a   :  { %3042 = vmatprep.mubr.bf16.mxu1 %v703_v35  ;;  %v4788_v35 = vmax.f32 %v4132_v17, 0.0  ;;  %3134 = vmatprep.subr.bf16.mxu1 %v3342_v59 }
 0x17b   :  { %4785 = vst [vmem:[#allocation19_spill] sm:$0xff] %v4161_v61  ;;  %v4686_v18 = vmax.f32 %v4161_v61, 0.0  ;;  %4796 = vst [vmem:[#allocation23_spill] sm:$0xff] %v4191_v41  ;;  %v4690_v55 = vmax.f32 %v4191_v41, 0.0  ;;  %3135 = vmatpush3.bf16.msra.mxu1 %v3342_v59  ;;  %v3347_v59 = vld [vmem:[#allocation7 + $0x90] sm:$0xff]   ;;  %v3348_v61 = vld [vmem:[#allocation7 + $0x88] sm:$0xff]  }
 0x17c   :  { %v705_v47 = vpack.c.bf16 %v4688_v53, %v4788_v35  ;;  %v4689_v35 = vmax.f32 %v4174_v34, 0.0 }
 0x17d   :  { %v707_v26 = vpack.c.bf16 %v4685_v49, %v4686_v18  ;;  %v3345_v49 = vld [vmem:[#allocation7 + $0xa0] sm:$0xff]   ;;  %v3346_v18 = vld [vmem:[#allocation7 + $0x98] sm:$0xff]  }
 0x181   :  { %3043 = vmatmul.mubr.bf16.gmra.mxu1 %v704_v63  ;;  %v4194_v63 = vadd.f32 %v513_v13, %v4797_v19  ;;  %v3343_v13 = vld [vmem:[#allocation7 + $0xb0] sm:$0xff]  }
 0x182   :  { %3046 = vmatprep.mubr.bf16.mxu1 %v705_v47  ;;  %v706_v47 = vpack.c.bf16 %v4689_v35, %v4687_v20  ;;  %3136 = vmatprep.subr.bf16.mxu1 %v3343_v13 }
 0x183   :  { %4798 = vst [vmem:[#allocation24_spill] sm:$0xff] %v4194_v63  ;;  %v4691_v44 = vmax.f32 %v4194_v63, 0.0  ;;  %3137 = vmatpush3.bf16.msra.mxu1 %v3343_v13 }
 0x184   :  { %3138 = vmatprep.subr.bf16.mxu1 %v3344_v6 }
 0x185   :  { %v708_v32 = vpack.c.bf16 %v4691_v44, %v4690_v55 }
 0x187   :  { %3139 = vmatpush3.bf16.msra.mxu1 %v3344_v6 }
 0x188   :  { %3140 = vmatprep.subr.bf16.mxu1 %v3345_v49 }
 0x189   :  { %3047 = vmatmul.mubr.bf16.gmra.mxu1 %v706_v47 }
 0x18a   :  { %3050 = vmatprep.mubr.bf16.mxu1 %v707_v26 }
 0x18b   :  { %3141 = vmatpush3.bf16.msra.mxu1 %v3345_v49 }
 0x18c   :  { %3142 = vmatprep.subr.bf16.mxu1 %v3346_v18 }
 0x18f   :  { %3143 = vmatpush3.bf16.msra.mxu1 %v3346_v18 }
 0x190   :  { %3144 = vmatprep.subr.bf16.mxu1 %v3347_v59 }
 0x191   :  { %3051 = vmatmul.mubr.bf16.gmra.mxu1 %v708_v32 }
 0x193   :  { %3145 = vmatpush3.bf16.msra.mxu1 %v3347_v59 }
 0x194   :  { %3146 = vmatprep.subr.bf16.mxu1 %v3348_v61 }
 0x197   :  { %3147 = vmatpush3.bf16.msra.mxu1 %v3348_v61 }
 0x1d9   :  { %v2992_v26 = vpop.f32.mrf.mxu1 }
 0x1da   :  { %v1048_v32 = vmax.f32 %v2992_v26, 0.0  ;;  %v3349_v26 = vld [vmem:[#allocation7 + $0x80] sm:$0xff]  }
 0x1db   :  { %v791_v19 = vpop.f32.mrf.mxu1  ;;  %3148 = vmatprep.subr.bf16.mxu1 %v3349_v26 }
 0x1dc   :  { %v1046_v35 = vmax.f32 %v791_v19, 0.0  ;;  %3149 = vmatpush3.bf16.msra.mxu1 %v3349_v26 }
 0x1dd   :  { %v2993_v47 = vpop.f32.mrf.mxu1 }
 0x1de   :  { %v1049_v20 = vmax.f32 %v2993_v47, 0.0 }
 0x1df   :  { %v794_v53 = vpop.f32.mrf.mxu1 }
 0x1e0   :  { %v1047_v55 = vmax.f32 %v794_v53, 0.0  ;;  %v1111_v13 = vpack.c.bf16 %v1049_v20, %v1048_v32 }
 0x1e1   :  { %v2996_v44 = vpop.f32.mrf.mxu1 }
 0x1e2   :  { %v1110_v41 = vpack.c.bf16 %v1047_v55, %v1046_v35  ;;  %v1052_v53 = vmax.f32 %v2996_v44, 0.0 }
 0x1e3   :  { %v807_v57 = vpop.f32.mrf.mxu1 }
 0x1e4   :  { %3070 = vmatprep.mubr.bf16.mxu0 %v1110_v41  ;;  %v1050_v16 = vmax.f32 %v807_v57, 0.0 }
 0x1e5   :  { %v2997_v6 = vpop.f32.mrf.mxu1  ;;  %3071 = vmatmul.mubr.bf16.vlgmr.msra.gmra.mxu0 %v1111_v13 }
 0x1e6   :  { %v1053_v63 = vmax.f32 %v2997_v6, 0.0 }
 0x1e7   :  { %v810_v47 = vpop.f32.mrf.mxu1 }
 0x1e8   :  { %v1051_v3 = vmax.f32 %v810_v47, 0.0  ;;  %v1113_v17 = vpack.c.bf16 %v1053_v63, %v1052_v53 }
 0x1e9   :  { %v3000_v49 = vpop.f32.mrf.mxu1 }
 0x1ea   :  { %v1112_v19 = vpack.c.bf16 %v1051_v3, %v1050_v16  ;;  %v1056_v57 = vmax.f32 %v3000_v49, 0.0 }
 0x1eb   :  { %v823_v35 = vpop.f32.mrf.mxu1 }
 0x1ec   :  { %3074 = vmatprep.mubr.bf16.mxu0 %v1112_v19  ;;  %v1054_v55 = vmax.f32 %v823_v35, 0.0 }
 0x1ed   :  { %v3001_v20 = vpop.f32.mrf.mxu1  ;;  %3075 = vmatmul.mubr.bf16.gmra.mxu0 %v1113_v17 }
 0x1ee   :  { %v1057_v18 = vmax.f32 %v3001_v20, 0.0 }
 0x1ef   :  { %v826_v41 = vpop.f32.mrf.mxu1 }
 0x1f0   :  { %v1055_v32 = vmax.f32 %v826_v41, 0.0  ;;  %v1115_v44 = vpack.c.bf16 %v1057_v18, %v1056_v57 }
 0x1f1   :  { %v3004_v13 = vpop.f32.mrf.mxu1 }
 0x1f2   :  { %v1114_v59 = vpack.c.bf16 %v1055_v32, %v1054_v55  ;;  %v1060_v53 = vmax.f32 %v3004_v13, 0.0 }
 0x1f3   :  { %v839_v6 = vpop.f32.mrf.mxu1 }
 0x1f4   :  { %3078 = vmatprep.mubr.bf16.mxu0 %v1114_v59  ;;  %v1058_v63 = vmax.f32 %v839_v6, 0.0 }
 0x1f5   :  { %v3005_v47 = vpop.f32.mrf.mxu1  ;;  %3079 = vmatmul.mubr.bf16.gmra.mxu0 %v1115_v44 }
 0x1f6   :  { %v1061_v3 = vmax.f32 %v3005_v47, 0.0 }
 0x1f7   :  { %v842_v16 = vpop.f32.mrf.mxu1 }
 0x1f8   :  { %v1059_v61 = vmax.f32 %v842_v16, 0.0  ;;  %v1117_v20 = vpack.c.bf16 %v1061_v3, %v1060_v53 }
 0x1f9   :  { %v3008_v17 = vpop.f32.mrf.mxu1 }
 0x1fa   :  { %v1116_v19 = vpack.c.bf16 %v1059_v61, %v1058_v63  ;;  %v1064_v55 = vmax.f32 %v3008_v17, 0.0 }
 0x1fb   :  { %v855_v34 = vpop.f32.mrf.mxu1 }
 0x1fc   :  { %3082 = vmatprep.mubr.bf16.mxu0 %v1116_v19  ;;  %v1062_v41 = vmax.f32 %v855_v34, 0.0 }
 0x1fd   :  { %v3009_v35 = vpop.f32.mrf.mxu1  ;;  %3083 = vmatmul.mubr.bf16.gmra.mxu0 %v1117_v20 }
 0x1fe   :  { %v1065_v49 = vmax.f32 %v3009_v35, 0.0 }
 0x1ff   :  { %v858_v26 = vpop.f32.mrf.mxu1 }
 0x200   :  { %v1063_v18 = vmax.f32 %v858_v26, 0.0  ;;  %v1119_v59 = vpack.c.bf16 %v1065_v49, %v1064_v55 }
 0x201   :  { %v3012_v32 = vpop.f32.mrf.mxu1 }
 0x202   :  { %v1118_v57 = vpack.c.bf16 %v1063_v18, %v1062_v41  ;;  %v1068_v63 = vmax.f32 %v3012_v32, 0.0 }
 0x203   :  { %v871_v44 = vpop.f32.mrf.mxu1 }
 0x204   :  { %3086 = vmatprep.mubr.bf16.mxu0 %v1118_v57  ;;  %v1066_v16 = vmax.f32 %v871_v44, 0.0 }
 0x205   :  { %v3013_v6 = vpop.f32.mrf.mxu1  ;;  %3087 = vmatmul.mubr.bf16.gmra.mxu0 %v1119_v59 }
 0x206   :  { %v1069_v13 = vmax.f32 %v3013_v6, 0.0 }
 0x207   :  { %v874_v47 = vpop.f32.mrf.mxu1 }
 0x208   :  { %v1067_v3 = vmax.f32 %v874_v47, 0.0  ;;  %v1121_v19 = vpack.c.bf16 %v1069_v13, %v1068_v63 }
 0x209   :  { %v3016_v61 = vpop.f32.mrf.mxu1 }
 0x20a   :  { %v1120_v53 = vpack.c.bf16 %v1067_v3, %v1066_v16  ;;  %v1072_v41 = vmax.f32 %v3016_v61, 0.0 }
 0x20b   :  { %v887_v20 = vpop.f32.mrf.mxu1 }
 0x20c   :  { %3090 = vmatprep.mubr.bf16.mxu0 %v1120_v53  ;;  %v1070_v26 = vmax.f32 %v887_v20, 0.0 }
 0x20d   :  { %v3017_v34 = vpop.f32.mrf.mxu1  ;;  %3091 = vmatmul.mubr.bf16.gmra.mxu0 %v1121_v19 }
 0x20e   :  { %v1073_v17 = vmax.f32 %v3017_v34, 0.0 }
 0x20f   :  { %v890_v35 = vpop.f32.mrf.mxu1 }
 0x210   :  { %v1071_v49 = vmax.f32 %v890_v35, 0.0  ;;  %v1123_v57 = vpack.c.bf16 %v1073_v17, %v1072_v41 }
 0x211   :  { %v3020_v18 = vpop.f32.mrf.mxu1 }
 0x212   :  { %v1122_v55 = vpack.c.bf16 %v1071_v49, %v1070_v26  ;;  %v1076_v16 = vmax.f32 %v3020_v18, 0.0 }
 0x213   :  { %v903_v59 = vpop.f32.mrf.mxu1 }
 0x214   :  { %3094 = vmatprep.mubr.bf16.mxu0 %v1122_v55  ;;  %v1074_v47 = vmax.f32 %v903_v59, 0.0 }
 0x215   :  { %v3021_v44 = vpop.f32.mrf.mxu1  ;;  %3095 = vmatmul.mubr.bf16.gmra.mxu0 %v1123_v57 }
 0x216   :  { %v1077_v32 = vmax.f32 %v3021_v44, 0.0 }
 0x217   :  { %v906_v6 = vpop.f32.mrf.mxu1 }
 0x218   :  { %v1075_v13 = vmax.f32 %v906_v6, 0.0  ;;  %v1125_v53 = vpack.c.bf16 %v1077_v32, %v1076_v16 }
 0x219   :  { %v3024_v3 = vpop.f32.mrf.mxu1 }
 0x21a   :  { %v1124_v63 = vpack.c.bf16 %v1075_v13, %v1074_v47  ;;  %v1080_v26 = vmax.f32 %v3024_v3, 0.0 }
 0x21b   :  { %v919_v19 = vpop.f32.mrf.mxu1 }
 0x21c   :  { %3098 = vmatprep.mubr.bf16.mxu0 %v1124_v63  ;;  %v1078_v35 = vmax.f32 %v919_v19, 0.0 }
 0x21d   :  { %v3025_v20 = vpop.f32.mrf.mxu1  ;;  %3099 = vmatmul.mubr.bf16.gmra.mxu0 %v1125_v53 }
 0x21e   :  { %v1081_v61 = vmax.f32 %v3025_v20, 0.0 }
 0x21f   :  { %v922_v34 = vpop.f32.mrf.mxu1 }
 0x220   :  { %v1079_v17 = vmax.f32 %v922_v34, 0.0  ;;  %v1127_v55 = vpack.c.bf16 %v1081_v61, %v1080_v26 }
 0x221   :  { %v3028_v49 = vpop.f32.mrf.mxu1 }
 0x222   :  { %v1126_v41 = vpack.c.bf16 %v1079_v17, %v1078_v35  ;;  %v1084_v47 = vmax.f32 %v3028_v49, 0.0 }
 0x223   :  { %v935_v57 = vpop.f32.mrf.mxu1 }
 0x224   :  { %3102 = vmatprep.mubr.bf16.mxu0 %v1126_v41  ;;  %v1082_v6 = vmax.f32 %v935_v57, 0.0 }
 0x225   :  { %v3029_v59 = vpop.f32.mrf.mxu1  ;;  %3103 = vmatmul.mubr.bf16.gmra.mxu0 %v1127_v55 }
 0x226   :  { %v1085_v18 = vmax.f32 %v3029_v59, 0.0 }
 0x227   :  { %v938_v44 = vpop.f32.mrf.mxu1 }
 0x228   :  { %v1083_v32 = vmax.f32 %v938_v44, 0.0  ;;  %v1129_v63 = vpack.c.bf16 %v1085_v18, %v1084_v47 }
 0x229   :  { %v3032_v13 = vpop.f32.mrf.mxu1 }
 0x22a   :  { %v1128_v16 = vpack.c.bf16 %v1083_v32, %v1082_v6  ;;  %v1088_v35 = vmax.f32 %v3032_v13, 0.0 }
 0x22b   :  { %v951_v53 = vpop.f32.mrf.mxu1 }
 0x22c   :  { %3106 = vmatprep.mubr.bf16.mxu0 %v1128_v16  ;;  %v1086_v34 = vmax.f32 %v951_v53, 0.0 }
 0x22d   :  { %v3033_v19 = vpop.f32.mrf.mxu1  ;;  %3107 = vmatmul.mubr.bf16.gmra.mxu0 %v1129_v63 }
 0x22e   :  { %v1089_v3 = vmax.f32 %v3033_v19, 0.0 }
 0x22f   :  { %v954_v20 = vpop.f32.mrf.mxu1 }
 0x230   :  { %v1087_v61 = vmax.f32 %v954_v20, 0.0  ;;  %v1131_v41 = vpack.c.bf16 %v1089_v3, %v1088_v35 }
 0x231   :  { %v3036_v17 = vpop.f32.mrf.mxu1 }
 0x232   :  { %v1130_v26 = vpack.c.bf16 %v1087_v61, %v1086_v34  ;;  %v1092_v6 = vmax.f32 %v3036_v17, 0.0 }
 0x233   :  { %v967_v55 = vpop.f32.mrf.mxu1 }
 0x234   :  { %3110 = vmatprep.mubr.bf16.mxu0 %v1130_v26  ;;  %v1090_v44 = vmax.f32 %v967_v55, 0.0 }
 0x235   :  { %v3037_v57 = vpop.f32.mrf.mxu1  ;;  %3111 = vmatmul.mubr.bf16.gmra.mxu0 %v1131_v41 }
 0x236   :  { %v1093_v49 = vmax.f32 %v3037_v57, 0.0 }
 0x237   :  { %v970_v59 = vpop.f32.mrf.mxu1 }
 0x238   :  { %v1091_v18 = vmax.f32 %v970_v59, 0.0  ;;  %v1133_v16 = vpack.c.bf16 %v1093_v49, %v1092_v6 }
 0x239   :  { %v3040_v32 = vpop.f32.mrf.mxu1 }
 0x23a   :  { %v1132_v47 = vpack.c.bf16 %v1091_v18, %v1090_v44  ;;  %v1096_v34 = vmax.f32 %v3040_v32, 0.0 }
 0x23b   :  { %v983_v63 = vpop.f32.mrf.mxu1 }
 0x23c   :  { %3114 = vmatprep.mubr.bf16.mxu0 %v1132_v47  ;;  %v1094_v20 = vmax.f32 %v983_v63, 0.0 }
 0x23d   :  { %v3041_v53 = vpop.f32.mrf.mxu1  ;;  %3115 = vmatmul.mubr.bf16.gmra.mxu0 %v1133_v16 }
 0x23e   :  { %v1097_v13 = vmax.f32 %v3041_v53, 0.0 }
 0x23f   :  { %v986_v19 = vpop.f32.mrf.mxu1 }
 0x240   :  { %v1095_v3 = vmax.f32 %v986_v19, 0.0  ;;  %v1135_v26 = vpack.c.bf16 %v1097_v13, %v1096_v34 }
 0x241   :  { %v3044_v61 = vpop.f32.mrf.mxu1 }
 0x242   :  { %v1134_v35 = vpack.c.bf16 %v1095_v3, %v1094_v20  ;;  %v1100_v44 = vmax.f32 %v3044_v61, 0.0 }
 0x243   :  { %v999_v41 = vpop.f32.mrf.mxu1 }
 0x244   :  { %3118 = vmatprep.mubr.bf16.mxu0 %v1134_v35  ;;  %v1098_v59 = vmax.f32 %v999_v41, 0.0 }
 0x245   :  { %v3045_v55 = vpop.f32.mrf.mxu1  ;;  %3119 = vmatmul.mubr.bf16.gmra.mxu0 %v1135_v26 }
 0x246   :  { %v1101_v17 = vmax.f32 %v3045_v55, 0.0 }
 0x247   :  { %v1002_v57 = vpop.f32.mrf.mxu1 }
 0x248   :  { %v1099_v49 = vmax.f32 %v1002_v57, 0.0  ;;  %v1137_v47 = vpack.c.bf16 %v1101_v17, %v1100_v44 }
 0x249   :  { %v3048_v18 = vpop.f32.mrf.mxu1 }
 0x24a   :  { %v1136_v6 = vpack.c.bf16 %v1099_v49, %v1098_v59  ;;  %v1104_v20 = vmax.f32 %v3048_v18, 0.0  ;;  %v3351_v18 = vld [vmem:[#allocation7 + $0xf0] sm:$0xff]  }
 0x24b   :  { %v1015_v16 = vpop.f32.mrf.mxu1 }
 0x24c   :  { %3122 = vmatprep.mubr.bf16.mxu0 %v1136_v6  ;;  %v1102_v19 = vmax.f32 %v1015_v16, 0.0  ;;  %v3350_v6 = vld [vmem:[#allocation7 + $0xf8] sm:$0xff]  }
 0x24d   :  { %v3049_v63 = vpop.f32.mrf.mxu1  ;;  %3123 = vmatmul.mubr.bf16.gmra.mxu0 %v1137_v47  ;;  %3214 = vmatprep.subr.bf16.mxu0 %v3350_v6  ;;  %v3352_v47 = vld [vmem:[#allocation7 + $0xe8] sm:$0xff]  }
 0x24e   :  { %v1105_v32 = vmax.f32 %v3049_v63, 0.0  ;;  %3215 = vmatpush3.bf16.msra.mxu0 %v3350_v6  ;;  %v4804_v6 = vld [vmem:[#allocation36_spill] sm:$0xff] }
 0x24f   :  { %v1018_v53 = vpop.f32.mrf.mxu1  ;;  %3216 = vmatprep.subr.bf16.mxu0 %v3351_v18 }
 0x250   :  { %v1103_v13 = vmax.f32 %v1018_v53, 0.0  ;;  %v1139_v35 = vpack.c.bf16 %v1105_v32, %v1104_v20 }
 0x251   :  { %v3052_v3 = vpop.f32.mrf.mxu1 }
 0x252   :  { %v1138_v34 = vpack.c.bf16 %v1103_v13, %v1102_v19  ;;  %v1108_v59 = vmax.f32 %v3052_v3, 0.0  ;;  %3217 = vmatpush3.bf16.msra.mxu0 %v3351_v18  ;;  %v3353_v3 = vld [vmem:[#allocation7 + $0xe0] sm:$0xff]   ;;  %v4805_v18 = vmax.f32 %v4804_v6, 0.0 }
 0x253   :  { %v1031_v26 = vpop.f32.mrf.mxu1  ;;  %3218 = vmatprep.subr.bf16.mxu0 %v3352_v47 }
 0x254   :  { %3126 = vmatprep.mubr.bf16.mxu0 %v1138_v34  ;;  %v1106_v57 = vmax.f32 %v1031_v26, 0.0  ;;  %v3354_v34 = vld [vmem:[#allocation7 + $0xd8] sm:$0xff]   ;;  %v4799_v26 = vmax.f32 %v3699_v24, 0.0  ;;  %v3355_v24 = vld [vmem:[#allocation7 + $0xd0] sm:$0xff]  }
 0x255   :  { %v3053_v41 = vpop.f32.mrf.mxu1  ;;  %3127 = vmatmul.mubr.bf16.gmra.mxu0 %v1139_v35 }
 0x256   :  { %v1109_v61 = vmax.f32 %v3053_v41, 0.0  ;;  %3219 = vmatpush3.bf16.msra.mxu0 %v3352_v47 }
 0x257   :  { %v1034_v55 = vpop.f32.mrf.mxu1  ;;  %3220 = vmatprep.subr.bf16.mxu0 %v3353_v3 }
 0x258   :  { %v1107_v17 = vmax.f32 %v1034_v55, 0.0  ;;  %v1141_v44 = vpack.c.bf16 %v1109_v61, %v1108_v59  ;;  %v4800_v55 = vld [vmem:[#allocation35_spill] sm:$0xff]  ;;  %v4802_v59 = vld [vmem:[#allocation37_spill] sm:$0xff] }
 0x25a   :  { %v1140_v49 = vpack.c.bf16 %v1107_v17, %v1106_v57  ;;  %v4801_v57 = vmax.f32 %v4800_v55, 0.0  ;;  %3221 = vmatpush3.bf16.msra.mxu0 %v3353_v3  ;;  %v4806_v55 = vmax.f32 %v3735_v33, 0.0 }
 0x25b   :  { %3222 = vmatprep.subr.bf16.mxu0 %v3354_v34 }
 0x25c   :  { %3130 = vmatprep.mubr.bf16.mxu0 %v1140_v49  ;;  %v4803_v49 = vmax.f32 %v4802_v59, 0.0 }
 0x25d   :  { %3131 = vmatmul.mubr.bf16.gmra.mxu0 %v1141_v44 }
 0x25e   :  { %3223 = vmatpush3.bf16.msra.mxu0 %v3354_v34  ;;  %v4811_v34 = vld [vmem:[#allocation38_spill] sm:$0xff] }
 0x25f   :  { %3224 = vmatprep.subr.bf16.mxu0 %v3355_v24 }
 0x262   :  { %3225 = vmatpush3.bf16.msra.mxu0 %v3355_v24 }
 0x2a5   :  { %v3072_v16 = vpop.f32.mrf.mxu0 }
 0x2a6   :  { %v1481_v13 = vmax.f32 %v3072_v16, 0.0 }
 0x2a7   :  { %v1224_v63 = vpop.f32.mrf.mxu0 }
 0x2a8   :  { %v1479_v53 = vmax.f32 %v1224_v63, 0.0  ;;  %v4220_v47 = vadd.f32 %v1481_v13, %v4805_v18  ;;  %v3356_v13 = vld [vmem:[#allocation7 + $0xc8] sm:$0xff]   ;;  %v4808_v18 = vld [vmem:[#allocation39_spill] sm:$0xff] }
 0x2a9   :  { %v3073_v32 = vpop.f32.mrf.mxu0  ;;  %3226 = vmatprep.subr.bf16.mxu0 %v3356_v13 }
 0x2aa   :  { %v1482_v19 = vmax.f32 %v3073_v32, 0.0  ;;  %v4212_v17 = vadd.f32 %v1479_v53, %v4801_v57  ;;  %3227 = vmatpush3.bf16.msra.mxu0 %v3356_v13  ;;  %v4816_v13 = vmax.f32 %v3773_v48, 0.0 }
 0x2ab   :  { %v1227_v20 = vpop.f32.mrf.mxu0 }
 0x2ac   :  { %v1480_v35 = vmax.f32 %v1227_v20, 0.0  ;;  %v4208_v41 = vadd.f32 %v1482_v19, %v4799_v26 }
 0x2ad   :  { %v3076_v61 = vpop.f32.mrf.mxu0 }
 0x2ae   :  { %v4216_v44 = vadd.f32 %v1480_v35, %v4803_v49  ;;  %v1642_v32 = vpack.c.bf16 %v4208_v41, %v4220_v47  ;;  %v1485_v35 = vmax.f32 %v3076_v61, 0.0  ;;  %v4807_v49 = vmax.f32 %v3732_v54, 0.0 }
 0x2af   :  { %v1240_v16 = vpop.f32.mrf.mxu0  ;;  %v4812_v61 = vmax.f32 %v4811_v34, 0.0  ;;  %v4814_v34 = vmax.f32 %v3766_v15, 0.0 }
 0x2b0   :  { %v1641_v63 = vpack.c.bf16 %v4216_v44, %v4212_v17  ;;  %v1483_v19 = vmax.f32 %v1240_v16, 0.0  ;;  %v4809_v16 = vmax.f32 %v4808_v18, 0.0 }
 0x2b1   :  { %v3077_v53 = vpop.f32.mrf.mxu0 }
 0x2b2   :  { %v1486_v20 = vmax.f32 %v3077_v53, 0.0  ;;  %3150 = vmatprep.mubr.bf16.mxu1 %v1641_v63  ;;  %v4232_v6 = vadd.f32 %v1483_v19, %v4807_v49  ;;  %v4240_v63 = vadd.f32 %v1485_v35, %v4812_v61  ;;  %v4813_v49 = vmax.f32 %v3769_v22, 0.0 }
 0x2b3   :  { %v1243_v3 = vpop.f32.mrf.mxu0  ;;  %3151 = vmatmul.mubr.bf16.vlgmr.msra.gmra.mxu1 %v1642_v32 }
 0x2b4   :  { %v1484_v26 = vmax.f32 %v1243_v3, 0.0  ;;  %v4228_v57 = vadd.f32 %v1486_v20, %v4806_v55  ;;  %v3357_v3 = vld [vmem:[#allocation7 + $0xc0] sm:$0xff]  }
 0x2b5   :  { %v3080_v59 = vpop.f32.mrf.mxu0  ;;  %3228 = vmatprep.subr.bf16.mxu0 %v3357_v3 }
 0x2b6   :  { %v4236_v53 = vadd.f32 %v1484_v26, %v4809_v16  ;;  %v1644_v54 = vpack.c.bf16 %v4228_v57, %v4240_v63  ;;  %v1489_v26 = vmax.f32 %v3080_v59, 0.0  ;;  %3229 = vmatpush3.bf16.msra.mxu0 %v3357_v3  ;;  %v4817_v3 = vmax.f32 %v3801_v51, 0.0 }
 0x2b7   :  { %v1256_v32 = vpop.f32.mrf.mxu0 }
 0x2b8   :  { %4810 = vst [vmem:[#allocation21_spill] sm:$0xff] %v4236_v53  ;;  %v1643_v33 = vpack.c.bf16 %v4236_v53, %v4232_v6  ;;  %v1487_v19 = vmax.f32 %v1256_v32, 0.0  ;;  %v4815_v53 = vmax.f32 %v3776_v28, 0.0  ;;  %v4260_v59 = vadd.f32 %v1489_v26, %v4816_v13 }
 0x2b9   :  { %v3081_v20 = vpop.f32.mrf.mxu0 }
 0x2ba   :  { %v1490_v55 = vmax.f32 %v3081_v20, 0.0  ;;  %3154 = vmatprep.mubr.bf16.mxu1 %v1643_v33  ;;  %v4252_v61 = vadd.f32 %v1487_v19, %v4814_v34 }
 0x2bb   :  { %v1259_v24 = vpop.f32.mrf.mxu0  ;;  %3155 = vmatmul.mubr.bf16.gmra.mxu1 %v1644_v54 }
 0x2bc   :  { %v1488_v35 = vmax.f32 %v1259_v24, 0.0  ;;  %v4248_v18 = vadd.f32 %v1490_v55, %v4813_v49  ;;  %v4818_v24 = vmax.f32 %v3798_v46, 0.0  ;;  %v4820_v49 = vld [vmem:[#allocation41_spill] sm:$0xff] }
 0x2bd   :  { %v3084_v16 = vpop.f32.mrf.mxu0  ;;  %v4821_v34 = vmax.f32 %v4820_v49, 0.0 }
 0x2be   :  { %v4256_v32 = vadd.f32 %v1488_v35, %v4815_v53  ;;  %v1646_v54 = vpack.c.bf16 %v4248_v18, %v4260_v59  ;;  %v1493_v55 = vmax.f32 %v3084_v16, 0.0 }
 0x2bf   :  { %v1272_v33 = vpop.f32.mrf.mxu0 }
 0x2c0   :  { %v1645_v22 = vpack.c.bf16 %v4256_v32, %v4252_v61  ;;  %v1491_v15 = vmax.f32 %v1272_v33, 0.0  ;;  %v4823_v33 = vld [vmem:[#allocation40_spill] sm:$0xff] }
 0x2c1   :  { %v3085_v20 = vpop.f32.mrf.mxu0 }
 0x2c2   :  { %v1494_v19 = vmax.f32 %v3085_v20, 0.0  ;;  %3158 = vmatprep.mubr.bf16.mxu1 %v1645_v22  ;;  %v4272_v35 = vadd.f32 %v1491_v15, %v4818_v24  ;;  %v4824_v20 = vmax.f32 %v4823_v33, 0.0  ;;  %v4825_v24 = vmax.f32 %v3833_v43, 0.0 }
 0x2c3   :  { %v1275_v28 = vpop.f32.mrf.mxu0  ;;  %3159 = vmatmul.mubr.bf16.gmra.mxu1 %v1646_v54 }
 0x2c4   :  { %v1492_v53 = vmax.f32 %v1275_v28, 0.0  ;;  %v4268_v48 = vadd.f32 %v1494_v19, %v4817_v3  ;;  %4819 = vst [vmem:[#allocation22_spill] sm:$0xff] %v4272_v35  ;;  %v4280_v22 = vadd.f32 %v1493_v55, %v4824_v20  ;;  %v4828_v20 = vld [vmem:[#allocation43_spill] sm:$0xff] }
 0x2c5   :  { %v3088_v26 = vpop.f32.mrf.mxu0 }
 0x2c6   :  { %v4276_v13 = vadd.f32 %v1492_v53, %v4821_v34  ;;  %v1648_v19 = vpack.c.bf16 %v4268_v48, %v4280_v22  ;;  %v1497_v15 = vmax.f32 %v3088_v26, 0.0  ;;  %v4827_v34 = vmax.f32 %v3830_v31, 0.0 }
 0x2c7   :  { %v1288_v16 = vpop.f32.mrf.mxu0 }
 0x2c8   :  { %4822 = vst [vmem:[#allocation27_spill] sm:$0xff] %v4276_v13  ;;  %v1647_v54 = vpack.c.bf16 %v4276_v13, %v4272_v35  ;;  %v1495_v28 = vmax.f32 %v1288_v16, 0.0  ;;  %v4829_v13 = vmax.f32 %v4828_v20, 0.0  ;;  %v4831_v16 = vld [vmem:[#allocation42_spill] sm:$0xff]  ;;  %v4834_v20 = vmax.f32 %v3862_v30, 0.0 }
 0x2c9   :  { %v3089_v51 = vpop.f32.mrf.mxu0 }
 0x2ca   :  { %v1498_v46 = vmax.f32 %v3089_v51, 0.0  ;;  %3162 = vmatprep.mubr.bf16.mxu1 %v1647_v54  ;;  %v4292_v33 = vadd.f32 %v1495_v28, %v4827_v34  ;;  %v4832_v51 = vmax.f32 %v4831_v16, 0.0 }
 0x2cb   :  { %v1291_v3 = vpop.f32.mrf.mxu0  ;;  %3163 = vmatmul.mubr.bf16.gmra.mxu1 %v1648_v19 }
 0x2cc   :  { %v1496_v53 = vmax.f32 %v1291_v3, 0.0  ;;  %v4288_v49 = vadd.f32 %v1498_v46, %v4825_v24  ;;  %v4300_v54 = vadd.f32 %v1497_v15, %v4832_v51  ;;  %v4835_v51 = vld [vmem:[#allocation45_spill] sm:$0xff] }
 0x2cd   :  { %v3092_v55 = vpop.f32.mrf.mxu0 }
 0x2ce   :  { %4826 = vst [vmem:[#allocation28_spill] sm:$0xff] %v4288_v49  ;;  %v4296_v35 = vadd.f32 %v1496_v53, %v4829_v13  ;;  %v1650_v43 = vpack.c.bf16 %v4288_v49, %v4300_v54  ;;  %v1501_v28 = vmax.f32 %v3092_v55, 0.0  ;;  %v4833_v53 = vmax.f32 %v3865_v23, 0.0 }
 0x2cf   :  { %v1304_v26 = vpop.f32.mrf.mxu0 }
 0x2d0   :  { %4830 = vst [vmem:[#allocation25_spill] sm:$0xff] %v4296_v35  ;;  %v1649_v19 = vpack.c.bf16 %v4296_v35, %v4292_v33  ;;  %v1499_v3 = vmax.f32 %v1304_v26, 0.0  ;;  %v4836_v35 = vmax.f32 %v4835_v51, 0.0  ;;  %v4838_v26 = vld [vmem:[#allocation44_spill] sm:$0xff]  ;;  %v4841_v51 = vmax.f32 %v3894_v56, 0.0 }
 0x2d1   :  { %v3093_v46 = vpop.f32.mrf.mxu0 }
 0x2d2   :  { %v1502_v31 = vmax.f32 %v3093_v46, 0.0  ;;  %3166 = vmatprep.mubr.bf16.mxu1 %v1649_v19  ;;  %v4312_v16 = vadd.f32 %v1499_v3, %v4834_v20  ;;  %v4839_v46 = vmax.f32 %v4838_v26, 0.0 }
 0x2d3   :  { %v1307_v24 = vpop.f32.mrf.mxu0  ;;  %3167 = vmatmul.mubr.bf16.gmra.mxu1 %v1650_v43 }
 0x2d4   :  { %v1500_v13 = vmax.f32 %v1307_v24, 0.0  ;;  %v4308_v34 = vadd.f32 %v1502_v31, %v4833_v53  ;;  %v4320_v19 = vadd.f32 %v1501_v28, %v4839_v46  ;;  %v4842_v46 = vmax.f32 %v3906_v5, 0.0 }
 0x2d5   :  { %v3096_v15 = vpop.f32.mrf.mxu0 }
 0x2d6   :  { %v4316_v49 = vadd.f32 %v1500_v13, %v4836_v35  ;;  %v1652_v23 = vpack.c.bf16 %v4308_v34, %v4320_v19  ;;  %v1505_v3 = vmax.f32 %v3096_v15, 0.0  ;;  %v4840_v13 = vmax.f32 %v3897_v8, 0.0 }
 0x2d7   :  { %v1320_v55 = vpop.f32.mrf.mxu0 }
 0x2d8   :  { %4837 = vst [vmem:[#allocation26_spill] sm:$0xff] %v4316_v49  ;;  %v1651_v43 = vpack.c.bf16 %v4316_v49, %v4312_v16  ;;  %v1503_v24 = vmax.f32 %v1320_v55, 0.0  ;;  %v4843_v55 = vmax.f32 %v3901_v58, 0.0 }
 0x2d9   :  { %v3097_v31 = vpop.f32.mrf.mxu0 }
 0x2da   :  { %v1506_v30 = vmax.f32 %v3097_v31, 0.0  ;;  %3170 = vmatprep.mubr.bf16.mxu1 %v1651_v43  ;;  %v4332_v26 = vadd.f32 %v1503_v24, %v4841_v51  ;;  %v4340_v43 = vadd.f32 %v1505_v3, %v4843_v55 }
 0x2db   :  { %v1323_v53 = vpop.f32.mrf.mxu0  ;;  %3171 = vmatmul.mubr.bf16.gmra.mxu1 %v1652_v23 }
 0x2dc   :  { %v1504_v35 = vmax.f32 %v1323_v53, 0.0  ;;  %v4328_v20 = vadd.f32 %v1506_v30, %v4840_v13  ;;  %v4845_v13 = vmax.f32 %v3936_v9, 0.0 }
 0x2dd   :  { %v3100_v28 = vpop.f32.mrf.mxu0 }
 0x2de   :  { %v4336_v49 = vadd.f32 %v1504_v35, %v4842_v46  ;;  %v1654_v8 = vpack.c.bf16 %v4328_v20, %v4340_v43  ;;  %v1509_v24 = vmax.f32 %v3100_v28, 0.0  ;;  %v4844_v35 = vmax.f32 %v3939_v11, 0.0 }
 0x2df   :  { %v1336_v15 = vpop.f32.mrf.mxu0  ;;  %v4846_v46 = vmax.f32 %v3947_v1, 0.0 }
 0x2e0   :  { %v1653_v23 = vpack.c.bf16 %v4336_v49, %v4332_v26  ;;  %v1507_v30 = vmax.f32 %v1336_v15, 0.0  ;;  %v4847_v15 = vmax.f32 %v3943_v10, 0.0 }
 0x2e1   :  { %v3101_v31 = vpop.f32.mrf.mxu0 }
 0x2e2   :  { %v1510_v56 = vmax.f32 %v3101_v31, 0.0  ;;  %3174 = vmatprep.mubr.bf16.mxu1 %v1653_v23  ;;  %v4352_v51 = vadd.f32 %v1507_v30, %v4845_v13  ;;  %v4360_v23 = vadd.f32 %v1509_v24, %v4847_v15 }
 0x2e3   :  { %v1339_v53 = vpop.f32.mrf.mxu0  ;;  %3175 = vmatmul.mubr.bf16.gmra.mxu1 %v1654_v8 }
 0x2e4   :  { %v1508_v5 = vmax.f32 %v1339_v53, 0.0  ;;  %v4348_v58 = vadd.f32 %v1510_v56, %v4844_v35  ;;  %v4849_v35 = vmax.f32 %v3919_v36, 0.0 }
 0x2e5   :  { %v3104_v3 = vpop.f32.mrf.mxu0 }
 0x2e6   :  { %v4356_v55 = vadd.f32 %v1508_v5, %v4846_v46  ;;  %v1656_v11 = vpack.c.bf16 %v4348_v58, %v4360_v23  ;;  %v1513_v30 = vmax.f32 %v3104_v3, 0.0  ;;  %v4848_v5 = vmax.f32 %v3982_v40, 0.0 }
 0x2e7   :  { %v1352_v28 = vpop.f32.mrf.mxu0  ;;  %v4850_v46 = vmax.f32 %v3927_v45, 0.0 }
 0x2e8   :  { %v1655_v8 = vpack.c.bf16 %v4356_v55, %v4352_v51  ;;  %v1511_v56 = vmax.f32 %v1352_v28, 0.0  ;;  %v4851_v28 = vmax.f32 %v3979_v38, 0.0 }
 0x2e9   :  { %v3105_v31 = vpop.f32.mrf.mxu0 }
 0x2ea   :  { %v1514_v9 = vmax.f32 %v3105_v31, 0.0  ;;  %3178 = vmatprep.mubr.bf16.mxu1 %v1655_v8  ;;  %v4372_v13 = vadd.f32 %v1511_v56, %v4849_v35  ;;  %v4380_v8 = vadd.f32 %v1513_v30, %v4851_v28 }
 0x2eb   :  { %v1355_v53 = vpop.f32.mrf.mxu0  ;;  %3179 = vmatmul.mubr.bf16.gmra.mxu1 %v1656_v11 }
 0x2ec   :  { %v1512_v1 = vmax.f32 %v1355_v53, 0.0  ;;  %v4368_v10 = vadd.f32 %v1514_v9, %v4848_v5  ;;  %v4853_v5 = vmax.f32 %v3965_v14, 0.0 }
 0x2ed   :  { %v3108_v24 = vpop.f32.mrf.mxu0 }
 0x2ee   :  { %v4376_v15 = vadd.f32 %v1512_v1, %v4850_v46  ;;  %v1658_v40 = vpack.c.bf16 %v4368_v10, %v4380_v8  ;;  %v1517_v56 = vmax.f32 %v3108_v24, 0.0  ;;  %v4852_v1 = vmax.f32 %v4018_v7, 0.0 }
 0x2ef   :  { %v1368_v3 = vpop.f32.mrf.mxu0  ;;  %v4854_v46 = vmax.f32 %v3972_v0, 0.0 }
 0x2f0   :  { %v1657_v11 = vpack.c.bf16 %v4376_v15, %v4372_v13  ;;  %v1515_v9 = vmax.f32 %v1368_v3, 0.0  ;;  %v4855_v3 = vmax.f32 %v4015_v39, 0.0 }
 0x2f1   :  { %v3109_v31 = vpop.f32.mrf.mxu0 }
 0x2f2   :  { %v1518_v36 = vmax.f32 %v3109_v31, 0.0  ;;  %3182 = vmatprep.mubr.bf16.mxu1 %v1657_v11  ;;  %v4392_v35 = vadd.f32 %v1515_v9, %v4853_v5  ;;  %v4400_v11 = vadd.f32 %v1517_v56, %v4855_v3 }
 0x2f3   :  { %v1371_v53 = vpop.f32.mrf.mxu0  ;;  %3183 = vmatmul.mubr.bf16.gmra.mxu1 %v1658_v40 }
 0x2f4   :  { %v1516_v45 = vmax.f32 %v1371_v53, 0.0  ;;  %v4388_v38 = vadd.f32 %v1518_v36, %v4852_v1  ;;  %v4857_v1 = vmax.f32 %v4005_v52, 0.0 }
 0x2f5   :  { %v3112_v30 = vpop.f32.mrf.mxu0 }
 0x2f6   :  { %v4396_v28 = vadd.f32 %v1516_v45, %v4854_v46  ;;  %v1660_v7 = vpack.c.bf16 %v4388_v38, %v4400_v11  ;;  %v1521_v9 = vmax.f32 %v3112_v30, 0.0  ;;  %v4856_v45 = vmax.f32 %v4052_v27, 0.0 }
 0x2f7   :  { %v1384_v24 = vpop.f32.mrf.mxu0  ;;  %v4858_v46 = vmax.f32 %v4008_v25, 0.0 }
 0x2f8   :  { %v1659_v40 = vpack.c.bf16 %v4396_v28, %v4392_v35  ;;  %v1519_v36 = vmax.f32 %v1384_v24, 0.0  ;;  %v4859_v24 = vmax.f32 %v4049_v4, 0.0 }
 0x2f9   :  { %v3113_v31 = vpop.f32.mrf.mxu0 }
 0x2fa   :  { %v1522_v14 = vmax.f32 %v3113_v31, 0.0  ;;  %3186 = vmatprep.mubr.bf16.mxu1 %v1659_v40  ;;  %v4412_v5 = vadd.f32 %v1519_v36, %v4857_v1  ;;  %v4420_v40 = vadd.f32 %v1521_v9, %v4859_v24 }
 0x2fb   :  { %v1387_v53 = vpop.f32.mrf.mxu0  ;;  %3187 = vmatmul.mubr.bf16.gmra.mxu1 %v1660_v7 }
 0x2fc   :  { %v1520_v0 = vmax.f32 %v1387_v53, 0.0  ;;  %v4408_v39 = vadd.f32 %v1522_v14, %v4856_v45  ;;  %v4862_v45 = vmax.f32 %v4039_v2, 0.0 }
 0x2fd   :  { %v3116_v56 = vpop.f32.mrf.mxu0 }
 0x2fe   :  { %v4416_v3 = vadd.f32 %v1520_v0, %v4858_v46  ;;  %v1662_v27 = vpack.c.bf16 %v4408_v39, %v4420_v40  ;;  %v1525_v36 = vmax.f32 %v3116_v56, 0.0  ;;  %v4860_v0 = vmax.f32 %v4084_v60, 0.0 }
 0x2ff   :  { %v1400_v30 = vpop.f32.mrf.mxu0  ;;  %v4863_v46 = vmax.f32 %v4042_v37, 0.0 }
 0x300   :  { %v1661_v7 = vpack.c.bf16 %v4416_v3, %v4412_v5  ;;  %v1523_v14 = vmax.f32 %v1400_v30, 0.0  ;;  %v4865_v30 = vmax.f32 %v4081_v50, 0.0 }
 0x301   :  { %v3117_v31 = vpop.f32.mrf.mxu0 }
 0x302   :  { %v1526_v52 = vmax.f32 %v3117_v31, 0.0  ;;  %3190 = vmatprep.mubr.bf16.mxu1 %v1661_v7  ;;  %v4432_v1 = vadd.f32 %v1523_v14, %v4862_v45  ;;  %v4440_v7 = vadd.f32 %v1525_v36, %v4865_v30  ;;  %v4869_v30 = vld [vmem:[#allocation15_spill] sm:$0xff] }
 0x303   :  { %v1403_v53 = vpop.f32.mrf.mxu0  ;;  %3191 = vmatmul.mubr.bf16.gmra.mxu1 %v1662_v27 }
 0x304   :  { %v1524_v25 = vmax.f32 %v1403_v53, 0.0  ;;  %v4428_v4 = vadd.f32 %v1526_v52, %v4860_v0  ;;  %v4867_v0 = vld [vmem:[#allocation12_spill] sm:$0xff] }
 0x305   :  { %v3120_v9 = vpop.f32.mrf.mxu0  ;;  %v4868_v45 = vmax.f32 %v4867_v0, 0.0  ;;  %v4875_v0 = vmax.f32 %v4102_v62, 0.0 }
 0x306   :  { %4861 = vst [vmem:[#allocation31_spill] sm:$0xff] %v4428_v4  ;;  %v4436_v24 = vadd.f32 %v1524_v25, %v4863_v46  ;;  %v1664_v60 = vpack.c.bf16 %v4428_v4, %v4440_v7  ;;  %v1529_v14 = vmax.f32 %v3120_v9, 0.0  ;;  %v4866_v25 = vmax.f32 %v4115_v42, 0.0 }
 0x307   :  { %v1416_v56 = vpop.f32.mrf.mxu0 }
 0x308   :  { %4864 = vst [vmem:[#allocation32_spill] sm:$0xff] %v4436_v24  ;;  %v1663_v27 = vpack.c.bf16 %v4436_v24, %v4432_v1  ;;  %v1527_v52 = vmax.f32 %v1416_v56, 0.0  ;;  %v4870_v24 = vmax.f32 %v4869_v30, 0.0  ;;  %v4872_v56 = vmax.f32 %v4112_v12, 0.0  ;;  %v4877_v30 = vld [vmem:[#allocation16_spill] sm:$0xff] }
 0x309   :  { %v3121_v31 = vpop.f32.mrf.mxu0 }
 0x30a   :  { %v1530_v2 = vmax.f32 %v3121_v31, 0.0  ;;  %3194 = vmatprep.mubr.bf16.mxu1 %v1663_v27  ;;  %v4452_v46 = vadd.f32 %v1527_v52, %v4868_v45  ;;  %v4460_v27 = vadd.f32 %v1529_v14, %v4872_v56  ;;  %v4878_v56 = vmax.f32 %v4877_v30, 0.0  ;;  %v4885_v30 = vld [vmem:[#allocation13_spill] sm:$0xff] }
 0x30b   :  { %v1419_v53 = vpop.f32.mrf.mxu0  ;;  %3195 = vmatmul.mubr.bf16.gmra.mxu1 %v1664_v60 }
 0x30c   :  { %v1528_v37 = vmax.f32 %v1419_v53, 0.0  ;;  %v4448_v50 = vadd.f32 %v1530_v2, %v4866_v25 }
 0x30d   :  { %v3124_v36 = vpop.f32.mrf.mxu0 }
 0x30e   :  { %v4456_v4 = vadd.f32 %v1528_v37, %v4870_v24  ;;  %v1666_v42 = vpack.c.bf16 %v4448_v50, %v4460_v27  ;;  %v1533_v52 = vmax.f32 %v3124_v36, 0.0  ;;  %v4873_v37 = vmax.f32 %v4145_v29, 0.0 }
 0x30f   :  { %v1432_v9 = vpop.f32.mrf.mxu0 }
 0x310   :  { %4871 = vst [vmem:[#allocation29_spill] sm:$0xff] %v4456_v4  ;;  %v1665_v60 = vpack.c.bf16 %v4456_v4, %v4452_v46  ;;  %v1531_v2 = vmax.f32 %v1432_v9, 0.0  ;;  %v4880_v9 = vmax.f32 %v4142_v21, 0.0 }
 0x311   :  { %v3125_v31 = vpop.f32.mrf.mxu0 }
 0x312   :  { %v1534_v53 = vmax.f32 %v3125_v31, 0.0  ;;  %3198 = vmatprep.mubr.bf16.mxu1 %v1665_v60  ;;  %v4472_v45 = vadd.f32 %v1531_v2, %v4875_v0  ;;  %v4480_v60 = vadd.f32 %v1533_v52, %v4880_v9 }
 0x313   :  { %v1435_v25 = vpop.f32.mrf.mxu0  ;;  %3199 = vmatmul.mubr.bf16.gmra.mxu1 %v1666_v42 }
 0x314   :  { %v1532_v24 = vmax.f32 %v1435_v25, 0.0  ;;  %v4468_v12 = vadd.f32 %v1534_v53, %v4873_v37  ;;  %4876 = vst [vmem:[#allocation33_spill] sm:$0xff] %v4472_v45  ;;  %4881 = vst [vmem:[#allocation35_spill] sm:$0xff] %v4480_v60  ;;  %v4882_v37 = vld [vmem:[#allocation18_spill] sm:$0xff] }
 0x315   :  { %v3128_v14 = vpop.f32.mrf.mxu0  ;;  %v4883_v0 = vmax.f32 %v4882_v37, 0.0 }
 0x316   :  { %4874 = vst [vmem:[#allocation30_spill] sm:$0xff] %v4468_v12  ;;  %v4476_v4 = vadd.f32 %v1532_v24, %v4878_v56  ;;  %v1668_v29 = vpack.c.bf16 %v4468_v12, %v4480_v60  ;;  %v1537_v2 = vmax.f32 %v3128_v14, 0.0  ;;  %v4886_v56 = vmax.f32 %v4885_v30, 0.0 }
 0x317   :  { %v1448_v36 = vpop.f32.mrf.mxu0 }
 0x318   :  { %4879 = vst [vmem:[#allocation34_spill] sm:$0xff] %v4476_v4  ;;  %v1667_v42 = vpack.c.bf16 %v4476_v4, %v4472_v45  ;;  %v1535_v53 = vmax.f32 %v1448_v36, 0.0  ;;  %v4888_v4 = vld [vmem:[#allocation14_spill] sm:$0xff]  ;;  %v4891_v36 = vld [vmem:[#allocation17_spill] sm:$0xff] }
 0x319   :  { %v3129_v31 = vpop.f32.mrf.mxu0  ;;  %v4889_v45 = vmax.f32 %v4888_v4, 0.0 }
 0x31a   :  { %v1538_v62 = vmax.f32 %v3129_v31, 0.0  ;;  %3202 = vmatprep.mubr.bf16.mxu1 %v1667_v42  ;;  %v4492_v9 = vadd.f32 %v1535_v53, %v4886_v56  ;;  %v4892_v31 = vmax.f32 %v4891_v36, 0.0 }
 0x31b   :  { %v1451_v25 = vpop.f32.mrf.mxu0  ;;  %3203 = vmatmul.mubr.bf16.gmra.mxu1 %v1668_v29 }
 0x31c   :  { %v1536_v24 = vmax.f32 %v1451_v25, 0.0  ;;  %v4488_v21 = vadd.f32 %v1538_v62, %v4883_v0  ;;  %4887 = vst [vmem:[#allocation36_spill] sm:$0xff] %v4492_v9  ;;  %v4500_v42 = vadd.f32 %v1537_v2, %v4892_v31  ;;  %v4897_v2 = vld [vmem:[#allocation19_spill] sm:$0xff] }
 0x31d   :  { %v3132_v52 = vpop.f32.mrf.mxu0  ;;  %v4898_v36 = vmax.f32 %v4897_v2, 0.0 }
 0x31e   :  { %4884 = vst [vmem:[#allocation37_spill] sm:$0xff] %v4488_v21  ;;  %v4496_v12 = vadd.f32 %v1536_v24, %v4889_v45  ;;  %4893 = vst [vmem:[#allocation38_spill] sm:$0xff] %v4500_v42  ;;  %v1670_v62 = vpack.c.bf16 %v4488_v21, %v4500_v42  ;;  %v1541_v53 = vmax.f32 %v3132_v52, 0.0  ;;  %v4894_v45 = vld [vmem:[#allocation24_spill] sm:$0xff]  ;;  %v4903_v21 = vld [vmem:[#allocation23_spill] sm:$0xff] }
 0x31f   :  { %v1464_v14 = vpop.f32.mrf.mxu0  ;;  %v4895_v24 = vmax.f32 %v4894_v45, 0.0 }
 0x320   :  { %4890 = vst [vmem:[#allocation39_spill] sm:$0xff] %v4496_v12  ;;  %v1669_v29 = vpack.c.bf16 %v4496_v12, %v4492_v9  ;;  %v1539_v37 = vmax.f32 %v1464_v14, 0.0  ;;  %v4900_v12 = vld [vmem:[#allocation20_spill] sm:$0xff]  ;;  %v4904_v14 = vmax.f32 %v4903_v21, 0.0 }
 0x321   :  { %v3133_v25 = vpop.f32.mrf.mxu0  ;;  %v4901_v9 = vmax.f32 %v4900_v12, 0.0 }
 0x322   :  { %v1542_v0 = vmax.f32 %v3133_v25, 0.0  ;;  %3206 = vmatprep.mubr.bf16.mxu1 %v1669_v29  ;;  %v4512_v31 = vadd.f32 %v1539_v37, %v4898_v36  ;;  %v4520_v25 = vadd.f32 %v1541_v53, %v4904_v14 }
 0x323   :  { %v1467_v30 = vpop.f32.mrf.mxu0  ;;  %3207 = vmatmul.mubr.bf16.gmra.mxu1 %v1670_v62 }
 0x324   :  { %v1540_v4 = vmax.f32 %v1467_v30, 0.0  ;;  %v4508_v56 = vadd.f32 %v1542_v0, %v4895_v24  ;;  %4899 = vst [vmem:[#allocation40_spill] sm:$0xff] %v4512_v31  ;;  %4905 = vst [vmem:[#allocation42_spill] sm:$0xff] %v4520_v25 }
 0x326   :  { %4896 = vst [vmem:[#allocation41_spill] sm:$0xff] %v4508_v56  ;;  %v4516_v60 = vadd.f32 %v1540_v4, %v4901_v9  ;;  %v1672_v29 = vpack.c.bf16 %v4508_v56, %v4520_v25 }
 0x328   :  { %4902 = vst [vmem:[#allocation43_spill] sm:$0xff] %v4516_v60  ;;  %v1671_v52 = vpack.c.bf16 %v4516_v60, %v4512_v31 }
 0x32a   :  { %3210 = vmatprep.mubr.bf16.mxu1 %v1671_v52 }
 0x32b   :  { %3211 = vmatmul.mubr.bf16.gmra.mxu1 %v1672_v29 }
 0x373   :  { %v3152_v62 = vpop.f32.mrf.mxu1 }
 0x374   :  { %v2012_v4 = vmax.f32 %v3152_v62, 0.0 }
 0x375   :  { %v1755_v0 = vpop.f32.mrf.mxu1 }
 0x376   :  { %v2010_v12 = vmax.f32 %v1755_v0, 0.0 }
 0x377   :  { %v3153_v37 = vpop.f32.mrf.mxu1 }
 0x378   :  { %v2013_v30 = vmax.f32 %v3153_v37, 0.0 }
 0x379   :  { %v1758_v45 = vpop.f32.mrf.mxu1 }
 0x37a   :  { %v2011_v9 = vmax.f32 %v1758_v45, 0.0  ;;  %v2075_v53 = vpack.c.bf16 %v2013_v30, %v2012_v4 }
 0x37b   :  { %v3156_v24 = vpop.f32.mrf.mxu1 }
 0x37c   :  { %v2074_v21 = vpack.c.bf16 %v2011_v9, %v2010_v12  ;;  %v2016_v29 = vmax.f32 %v3156_v24, 0.0 }
 0x37d   :  { %v1771_v2 = vpop.f32.mrf.mxu1 }
 0x37e   :  { %3230 = vmatprep.mubr.bf16.mxu0 %v2074_v21  ;;  %v2014_v56 = vmax.f32 %v1771_v2, 0.0 }
 0x37f   :  { %v3157_v36 = vpop.f32.mrf.mxu1  ;;  %3231 = vmatmul.mubr.bf16.vlgmr.msra.gmra.mxu0 %v2075_v53 }
 0x380   :  { %v2017_v14 = vmax.f32 %v3157_v36, 0.0 }
 0x381   :  { %v1774_v60 = vpop.f32.mrf.mxu1 }
 0x382   :  { %v2015_v52 = vmax.f32 %v1774_v60, 0.0  ;;  %v2077_v42 = vpack.c.bf16 %v2017_v14, %v2016_v29 }
 0x383   :  { %v3160_v31 = vpop.f32.mrf.mxu1 }
 0x384   :  { %v2076_v25 = vpack.c.bf16 %v2015_v52, %v2014_v56  ;;  %v2020_v9 = vmax.f32 %v3160_v31, 0.0 }
 0x385   :  { %v1787_v37 = vpop.f32.mrf.mxu1 }
 0x386   :  { %3234 = vmatprep.mubr.bf16.mxu0 %v2076_v25  ;;  %v2018_v12 = vmax.f32 %v1787_v37, 0.0 }
 0x387   :  { %v3161_v0 = vpop.f32.mrf.mxu1  ;;  %3235 = vmatmul.mubr.bf16.gmra.mxu0 %v2077_v42 }
 0x388   :  { %v2021_v62 = vmax.f32 %v3161_v0, 0.0 }
 0x389   :  { %v1790_v45 = vpop.f32.mrf.mxu1 }
 0x38a   :  { %v2019_v30 = vmax.f32 %v1790_v45, 0.0  ;;  %v2079_v53 = vpack.c.bf16 %v2021_v62, %v2020_v9 }
 0x38b   :  { %v3164_v4 = vpop.f32.mrf.mxu1 }
 0x38c   :  { %v2078_v21 = vpack.c.bf16 %v2019_v30, %v2018_v12  ;;  %v2024_v52 = vmax.f32 %v3164_v4, 0.0 }
 0x38d   :  { %v1803_v36 = vpop.f32.mrf.mxu1 }
 0x38e   :  { %3238 = vmatprep.mubr.bf16.mxu0 %v2078_v21  ;;  %v2022_v56 = vmax.f32 %v1803_v36, 0.0 }
 0x38f   :  { %v3165_v2 = vpop.f32.mrf.mxu1  ;;  %3239 = vmatmul.mubr.bf16.gmra.mxu0 %v2079_v53 }
 0x390   :  { %v2025_v60 = vmax.f32 %v3165_v2, 0.0 }
 0x391   :  { %v1806_v24 = vpop.f32.mrf.mxu1 }
 0x392   :  { %v2023_v14 = vmax.f32 %v1806_v24, 0.0  ;;  %v2081_v42 = vpack.c.bf16 %v2025_v60, %v2024_v52 }
 0x393   :  { %v3168_v25 = vpop.f32.mrf.mxu1 }
 0x394   :  { %v2080_v29 = vpack.c.bf16 %v2023_v14, %v2022_v56  ;;  %v2028_v30 = vmax.f32 %v3168_v25, 0.0 }
 0x395   :  { %v1819_v0 = vpop.f32.mrf.mxu1 }
 0x396   :  { %3242 = vmatprep.mubr.bf16.mxu0 %v2080_v29  ;;  %v2026_v12 = vmax.f32 %v1819_v0, 0.0 }
 0x397   :  { %v3169_v37 = vpop.f32.mrf.mxu1  ;;  %3243 = vmatmul.mubr.bf16.gmra.mxu0 %v2081_v42 }
 0x398   :  { %v2029_v31 = vmax.f32 %v3169_v37, 0.0 }
 0x399   :  { %v1822_v45 = vpop.f32.mrf.mxu1 }
 0x39a   :  { %v2027_v62 = vmax.f32 %v1822_v45, 0.0  ;;  %v2083_v53 = vpack.c.bf16 %v2029_v31, %v2028_v30 }
 0x39b   :  { %v3172_v9 = vpop.f32.mrf.mxu1 }
 0x39c   :  { %v2082_v21 = vpack.c.bf16 %v2027_v62, %v2026_v12  ;;  %v2032_v14 = vmax.f32 %v3172_v9, 0.0 }
 0x39d   :  { %v1835_v2 = vpop.f32.mrf.mxu1 }
 0x39e   :  { %3246 = vmatprep.mubr.bf16.mxu0 %v2082_v21  ;;  %v2030_v56 = vmax.f32 %v1835_v2, 0.0 }
 0x39f   :  { %v3173_v36 = vpop.f32.mrf.mxu1  ;;  %3247 = vmatmul.mubr.bf16.gmra.mxu0 %v2083_v53 }
 0x3a0   :  { %v2033_v4 = vmax.f32 %v3173_v36, 0.0 }
 0x3a1   :  { %v1838_v24 = vpop.f32.mrf.mxu1 }
 0x3a2   :  { %v2031_v60 = vmax.f32 %v1838_v24, 0.0  ;;  %v2085_v42 = vpack.c.bf16 %v2033_v4, %v2032_v14 }
 0x3a3   :  { %v3176_v52 = vpop.f32.mrf.mxu1 }
 0x3a4   :  { %v2084_v29 = vpack.c.bf16 %v2031_v60, %v2030_v56  ;;  %v2036_v62 = vmax.f32 %v3176_v52, 0.0 }
 0x3a5   :  { %v1851_v37 = vpop.f32.mrf.mxu1 }
 0x3a6   :  { %3250 = vmatprep.mubr.bf16.mxu0 %v2084_v29  ;;  %v2034_v12 = vmax.f32 %v1851_v37, 0.0 }
 0x3a7   :  { %v3177_v0 = vpop.f32.mrf.mxu1  ;;  %3251 = vmatmul.mubr.bf16.gmra.mxu0 %v2085_v42 }
 0x3a8   :  { %v2037_v25 = vmax.f32 %v3177_v0, 0.0 }
 0x3a9   :  { %v1854_v45 = vpop.f32.mrf.mxu1 }
 0x3aa   :  { %v2035_v31 = vmax.f32 %v1854_v45, 0.0  ;;  %v2087_v53 = vpack.c.bf16 %v2037_v25, %v2036_v62 }
 0x3ab   :  { %v3180_v30 = vpop.f32.mrf.mxu1 }
 0x3ac   :  { %v2086_v21 = vpack.c.bf16 %v2035_v31, %v2034_v12  ;;  %v2040_v60 = vmax.f32 %v3180_v30, 0.0 }
 0x3ad   :  { %v1867_v36 = vpop.f32.mrf.mxu1 }
 0x3ae   :  { %3254 = vmatprep.mubr.bf16.mxu0 %v2086_v21  ;;  %v2038_v56 = vmax.f32 %v1867_v36, 0.0 }
 0x3af   :  { %v3181_v2 = vpop.f32.mrf.mxu1  ;;  %3255 = vmatmul.mubr.bf16.gmra.mxu0 %v2087_v53 }
 0x3b0   :  { %v2041_v9 = vmax.f32 %v3181_v2, 0.0 }
 0x3b1   :  { %v1870_v24 = vpop.f32.mrf.mxu1 }
 0x3b2   :  { %v2039_v4 = vmax.f32 %v1870_v24, 0.0  ;;  %v2089_v42 = vpack.c.bf16 %v2041_v9, %v2040_v60 }
 0x3b3   :  { %v3184_v14 = vpop.f32.mrf.mxu1 }
 0x3b4   :  { %v2088_v29 = vpack.c.bf16 %v2039_v4, %v2038_v56  ;;  %v2044_v31 = vmax.f32 %v3184_v14, 0.0 }
 0x3b5   :  { %v1883_v0 = vpop.f32.mrf.mxu1 }
 0x3b6   :  { %3258 = vmatprep.mubr.bf16.mxu0 %v2088_v29  ;;  %v2042_v12 = vmax.f32 %v1883_v0, 0.0 }
 0x3b7   :  { %v3185_v37 = vpop.f32.mrf.mxu1  ;;  %3259 = vmatmul.mubr.bf16.gmra.mxu0 %v2089_v42 }
 0x3b8   :  { %v2045_v52 = vmax.f32 %v3185_v37, 0.0 }
 0x3b9   :  { %v1886_v45 = vpop.f32.mrf.mxu1 }
 0x3ba   :  { %v2043_v25 = vmax.f32 %v1886_v45, 0.0  ;;  %v2091_v53 = vpack.c.bf16 %v2045_v52, %v2044_v31 }
 0x3bb   :  { %v3188_v62 = vpop.f32.mrf.mxu1 }
 0x3bc   :  { %v2090_v21 = vpack.c.bf16 %v2043_v25, %v2042_v12  ;;  %v2048_v4 = vmax.f32 %v3188_v62, 0.0 }
 0x3bd   :  { %v1899_v2 = vpop.f32.mrf.mxu1 }
 0x3be   :  { %3262 = vmatprep.mubr.bf16.mxu0 %v2090_v21  ;;  %v2046_v56 = vmax.f32 %v1899_v2, 0.0 }
 0x3bf   :  { %v3189_v36 = vpop.f32.mrf.mxu1  ;;  %3263 = vmatmul.mubr.bf16.gmra.mxu0 %v2091_v53 }
 0x3c0   :  { %v2049_v30 = vmax.f32 %v3189_v36, 0.0 }
 0x3c1   :  { %v1902_v24 = vpop.f32.mrf.mxu1 }
 0x3c2   :  { %v2047_v9 = vmax.f32 %v1902_v24, 0.0  ;;  %v2093_v42 = vpack.c.bf16 %v2049_v30, %v2048_v4 }
 0x3c3   :  { %v3192_v60 = vpop.f32.mrf.mxu1 }
 0x3c4   :  { %v2092_v29 = vpack.c.bf16 %v2047_v9, %v2046_v56  ;;  %v2052_v25 = vmax.f32 %v3192_v60, 0.0 }
 0x3c5   :  { %v1915_v37 = vpop.f32.mrf.mxu1 }
 0x3c6   :  { %3266 = vmatprep.mubr.bf16.mxu0 %v2092_v29  ;;  %v2050_v12 = vmax.f32 %v1915_v37, 0.0 }
 0x3c7   :  { %v3193_v0 = vpop.f32.mrf.mxu1  ;;  %3267 = vmatmul.mubr.bf16.gmra.mxu0 %v2093_v42 }
 0x3c8   :  { %v2053_v14 = vmax.f32 %v3193_v0, 0.0 }
 0x3c9   :  { %v1918_v45 = vpop.f32.mrf.mxu1 }
 0x3ca   :  { %v2051_v52 = vmax.f32 %v1918_v45, 0.0  ;;  %v2095_v53 = vpack.c.bf16 %v2053_v14, %v2052_v25 }
 0x3cb   :  { %v3196_v31 = vpop.f32.mrf.mxu1 }
 0x3cc   :  { %v2094_v21 = vpack.c.bf16 %v2051_v52, %v2050_v12  ;;  %v2056_v9 = vmax.f32 %v3196_v31, 0.0 }
 0x3cd   :  { %v1931_v36 = vpop.f32.mrf.mxu1 }
 0x3ce   :  { %3270 = vmatprep.mubr.bf16.mxu0 %v2094_v21  ;;  %v2054_v56 = vmax.f32 %v1931_v36, 0.0 }
 0x3cf   :  { %v3197_v2 = vpop.f32.mrf.mxu1  ;;  %3271 = vmatmul.mubr.bf16.gmra.mxu0 %v2095_v53 }
 0x3d0   :  { %v2057_v62 = vmax.f32 %v3197_v2, 0.0 }
 0x3d1   :  { %v1934_v24 = vpop.f32.mrf.mxu1 }
 0x3d2   :  { %v2055_v30 = vmax.f32 %v1934_v24, 0.0  ;;  %v2097_v42 = vpack.c.bf16 %v2057_v62, %v2056_v9 }
 0x3d3   :  { %v3200_v4 = vpop.f32.mrf.mxu1 }
 0x3d4   :  { %v2096_v29 = vpack.c.bf16 %v2055_v30, %v2054_v56  ;;  %v2060_v52 = vmax.f32 %v3200_v4, 0.0 }
 0x3d5   :  { %v1947_v0 = vpop.f32.mrf.mxu1 }
 0x3d6   :  { %3274 = vmatprep.mubr.bf16.mxu0 %v2096_v29  ;;  %v2058_v12 = vmax.f32 %v1947_v0, 0.0 }
 0x3d7   :  { %v3201_v37 = vpop.f32.mrf.mxu1  ;;  %3275 = vmatmul.mubr.bf16.gmra.mxu0 %v2097_v42 }
 0x3d8   :  { %v2061_v60 = vmax.f32 %v3201_v37, 0.0 }
 0x3d9   :  { %v1950_v45 = vpop.f32.mrf.mxu1 }
 0x3da   :  { %v2059_v14 = vmax.f32 %v1950_v45, 0.0  ;;  %v2099_v53 = vpack.c.bf16 %v2061_v60, %v2060_v52 }
 0x3db   :  { %v3204_v25 = vpop.f32.mrf.mxu1 }
 0x3dc   :  { %v2098_v21 = vpack.c.bf16 %v2059_v14, %v2058_v12  ;;  %v2064_v30 = vmax.f32 %v3204_v25, 0.0 }
 0x3dd   :  { %v1963_v2 = vpop.f32.mrf.mxu1 }
 0x3de   :  { %3278 = vmatprep.mubr.bf16.mxu0 %v2098_v21  ;;  %v2062_v56 = vmax.f32 %v1963_v2, 0.0 }
 0x3df   :  { %v3205_v36 = vpop.f32.mrf.mxu1  ;;  %3279 = vmatmul.mubr.bf16.gmra.mxu0 %v2099_v53 }
 0x3e0   :  { %v2065_v31 = vmax.f32 %v3205_v36, 0.0 }
 0x3e1   :  { %v1966_v24 = vpop.f32.mrf.mxu1 }
 0x3e2   :  { %v2063_v62 = vmax.f32 %v1966_v24, 0.0  ;;  %v2101_v42 = vpack.c.bf16 %v2065_v31, %v2064_v30 }
 0x3e3   :  { %v3208_v9 = vpop.f32.mrf.mxu1 }
 0x3e4   :  { %v2100_v29 = vpack.c.bf16 %v2063_v62, %v2062_v56  ;;  %v2068_v14 = vmax.f32 %v3208_v9, 0.0 }
 0x3e5   :  { %v1979_v37 = vpop.f32.mrf.mxu1 }
 0x3e6   :  { %3282 = vmatprep.mubr.bf16.mxu0 %v2100_v29  ;;  %v2066_v12 = vmax.f32 %v1979_v37, 0.0 }
 0x3e7   :  { %v3209_v0 = vpop.f32.mrf.mxu1  ;;  %3283 = vmatmul.mubr.bf16.gmra.mxu0 %v2101_v42 }
 0x3e8   :  { %v2069_v4 = vmax.f32 %v3209_v0, 0.0 }
 0x3e9   :  { %v1982_v45 = vpop.f32.mrf.mxu1 }
 0x3ea   :  { %v2067_v60 = vmax.f32 %v1982_v45, 0.0  ;;  %v2103_v53 = vpack.c.bf16 %v2069_v4, %v2068_v14 }
 0x3eb   :  { %v3212_v52 = vpop.f32.mrf.mxu1 }
 0x3ec   :  { %v2102_v21 = vpack.c.bf16 %v2067_v60, %v2066_v12  ;;  %v2072_v62 = vmax.f32 %v3212_v52, 0.0 }
 0x3ed   :  { %v1995_v36 = vpop.f32.mrf.mxu1 }
 0x3ee   :  { %3286 = vmatprep.mubr.bf16.mxu0 %v2102_v21  ;;  %v2070_v56 = vmax.f32 %v1995_v36, 0.0 }
 0x3ef   :  { %v3213_v2 = vpop.f32.mrf.mxu1  ;;  %3287 = vmatmul.mubr.bf16.gmra.mxu0 %v2103_v53 }
 0x3f0   :  { %v2073_v25 = vmax.f32 %v3213_v2, 0.0 }
 0x3f1   :  { %v1998_v24 = vpop.f32.mrf.mxu1 }
 0x3f2   :  { %v2071_v31 = vmax.f32 %v1998_v24, 0.0  ;;  %v2105_v29 = vpack.c.bf16 %v2073_v25, %v2072_v62 }
 0x3f4   :  { %v2104_v30 = vpack.c.bf16 %v2071_v31, %v2070_v56 }
 0x3f6   :  { %3290 = vmatprep.mubr.bf16.mxu0 %v2104_v30 }
 0x3f7   :  { %3291 = vmatmul.mubr.bf16.gmra.mxu0 %v2105_v29 }
 0x43f   :  { %v3232_v42 = vpop.f32.mrf.mxu0 }
 0x440   :  { %v2445_v37 = vmax.f32 %v3232_v42, 0.0  ;;  %v4906_v42 = vld [vmem:[#allocation21_spill] sm:$0xff] }
 0x441   :  { %v2188_v0 = vpop.f32.mrf.mxu0 }
 0x442   :  { %v2509_v9 = vadd.f32 %v2445_v37, %v4220_v47  ;;  %v2443_v45 = vmax.f32 %v2188_v0, 0.0 }
 0x443   :  { %v3233_v4 = vpop.f32.mrf.mxu0 }
 0x444   :  { %2573 = vst [vmem:[#allocation8 + $0x10] sm:$0xff] %v2509_v9  ;;  %v2507_v12 = vadd.f32 %v2443_v45, %v4212_v17  ;;  %v2446_v60 = vmax.f32 %v3233_v4, 0.0 }
 0x445   :  { %v2191_v14 = vpop.f32.mrf.mxu0 }
 0x446   :  { %2571 = vst [vmem:[#allocation8] sm:$0xff] %v2507_v12  ;;  %v2510_v21 = vadd.f32 %v2446_v60, %v4208_v41  ;;  %v2444_v52 = vmax.f32 %v2191_v14, 0.0 }
 0x447   :  { %v3236_v53 = vpop.f32.mrf.mxu0 }
 0x448   :  { %2574 = vst [vmem:[#allocation8 + $0x18] sm:$0xff] %v2510_v21  ;;  %v2508_v36 = vadd.f32 %v2444_v52, %v4216_v44  ;;  %v2449_v2 = vmax.f32 %v3236_v53, 0.0 }
 0x449   :  { %v2204_v25 = vpop.f32.mrf.mxu0 }
 0x44a   :  { %2572 = vst [vmem:[#allocation8 + $0x8] sm:$0xff] %v2508_v36  ;;  %v2513_v47 = vadd.f32 %v2449_v2, %v4240_v63  ;;  %v2447_v24 = vmax.f32 %v2204_v25, 0.0  ;;  %v4907_v25 = vld [vmem:[#allocation22_spill] sm:$0xff] }
 0x44b   :  { %v3237_v56 = vpop.f32.mrf.mxu0 }
 0x44c   :  { %2577 = vst [vmem:[#allocation8 + $0x30] sm:$0xff] %v2513_v47  ;;  %v2511_v17 = vadd.f32 %v2447_v24, %v4232_v6  ;;  %v2450_v31 = vmax.f32 %v3237_v56, 0.0 }
 0x44d   :  { %v2207_v62 = vpop.f32.mrf.mxu0 }
 0x44e   :  { %2575 = vst [vmem:[#allocation8 + $0x20] sm:$0xff] %v2511_v17  ;;  %v2514_v41 = vadd.f32 %v2450_v31, %v4228_v57  ;;  %v2448_v30 = vmax.f32 %v2207_v62, 0.0  ;;  %v4908_v31 = vld [vmem:[#allocation27_spill] sm:$0xff] }
 0x44f   :  { %v3240_v29 = vpop.f32.mrf.mxu0 }
 0x450   :  { %2578 = vst [vmem:[#allocation8 + $0x38] sm:$0xff] %v2514_v41  ;;  %v2512_v44 = vadd.f32 %v2448_v30, %v4906_v42  ;;  %v2453_v37 = vmax.f32 %v3240_v29, 0.0 }
 0x451   :  { %v2220_v0 = vpop.f32.mrf.mxu0 }
 0x452   :  { %2576 = vst [vmem:[#allocation8 + $0x28] sm:$0xff] %v2512_v44  ;;  %v2517_v63 = vadd.f32 %v2453_v37, %v4260_v59  ;;  %v2451_v9 = vmax.f32 %v2220_v0, 0.0  ;;  %v4909_v0 = vld [vmem:[#allocation28_spill] sm:$0xff] }
 0x453   :  { %v3241_v45 = vpop.f32.mrf.mxu0 }
 0x454   :  { %2581 = vst [vmem:[#allocation8 + $0x50] sm:$0xff] %v2517_v63  ;;  %v2515_v6 = vadd.f32 %v2451_v9, %v4252_v61  ;;  %v2454_v4 = vmax.f32 %v3241_v45, 0.0  ;;  %v4910_v45 = vld [vmem:[#allocation25_spill] sm:$0xff] }
 0x455   :  { %v2223_v12 = vpop.f32.mrf.mxu0 }
 0x456   :  { %2579 = vst [vmem:[#allocation8 + $0x40] sm:$0xff] %v2515_v6  ;;  %v2518_v57 = vadd.f32 %v2454_v4, %v4248_v18  ;;  %v2452_v60 = vmax.f32 %v2223_v12, 0.0 }
 0x457   :  { %v3244_v14 = vpop.f32.mrf.mxu0 }
 0x458   :  { %2582 = vst [vmem:[#allocation8 + $0x58] sm:$0xff] %v2518_v57  ;;  %v2516_v21 = vadd.f32 %v2452_v60, %v4256_v32  ;;  %v2457_v52 = vmax.f32 %v3244_v14, 0.0 }
 0x459   :  { %v2236_v53 = vpop.f32.mrf.mxu0 }
 0x45a   :  { %2580 = vst [vmem:[#allocation8 + $0x48] sm:$0xff] %v2516_v21  ;;  %v2521_v59 = vadd.f32 %v2457_v52, %v4280_v22  ;;  %v2455_v36 = vmax.f32 %v2236_v53, 0.0 }
 0x45b   :  { %v3245_v2 = vpop.f32.mrf.mxu0 }
 0x45c   :  { %2585 = vst [vmem:[#allocation8 + $0x70] sm:$0xff] %v2521_v59  ;;  %v2519_v61 = vadd.f32 %v2455_v36, %v4907_v25  ;;  %v2458_v47 = vmax.f32 %v3245_v2, 0.0  ;;  %v4911_v36 = vld [vmem:[#allocation26_spill] sm:$0xff] }
 0x45d   :  { %v2239_v24 = vpop.f32.mrf.mxu0 }
 0x45e   :  { %2583 = vst [vmem:[#allocation8 + $0x60] sm:$0xff] %v2519_v61  ;;  %v2522_v18 = vadd.f32 %v2458_v47, %v4268_v48  ;;  %v2456_v56 = vmax.f32 %v2239_v24, 0.0 }
 0x45f   :  { %v3248_v17 = vpop.f32.mrf.mxu0 }
 0x460   :  { %2586 = vst [vmem:[#allocation8 + $0x78] sm:$0xff] %v2522_v18  ;;  %v2520_v32 = vadd.f32 %v2456_v56, %v4908_v31  ;;  %v2461_v62 = vmax.f32 %v3248_v17, 0.0 }
 0x461   :  { %v2252_v41 = vpop.f32.mrf.mxu0 }
 0x462   :  { %2584 = vst [vmem:[#allocation8 + $0x68] sm:$0xff] %v2520_v32  ;;  %v2525_v22 = vadd.f32 %v2461_v62, %v4300_v54  ;;  %v2459_v30 = vmax.f32 %v2252_v41, 0.0 }
 0x463   :  { %v3249_v29 = vpop.f32.mrf.mxu0 }
 0x464   :  { %2589 = vst [vmem:[#allocation8 + $0x90] sm:$0xff] %v2525_v22  ;;  %v2523_v42 = vadd.f32 %v2459_v30, %v4292_v33  ;;  %v2462_v44 = vmax.f32 %v3249_v29, 0.0 }
 0x465   :  { %v2255_v37 = vpop.f32.mrf.mxu0 }
 0x466   :  { %2587 = vst [vmem:[#allocation8 + $0x80] sm:$0xff] %v2523_v42  ;;  %v2526_v48 = vadd.f32 %v2462_v44, %v4909_v0  ;;  %v2460_v63 = vmax.f32 %v2255_v37, 0.0 }
 0x467   :  { %v3252_v9 = vpop.f32.mrf.mxu0 }
 0x468   :  { %2590 = vst [vmem:[#allocation8 + $0x98] sm:$0xff] %v2526_v48  ;;  %v2524_v6 = vadd.f32 %v2460_v63, %v4910_v45  ;;  %v2465_v4 = vmax.f32 %v3252_v9, 0.0 }
 0x469   :  { %v2268_v12 = vpop.f32.mrf.mxu0 }
 0x46a   :  { %2588 = vst [vmem:[#allocation8 + $0x88] sm:$0xff] %v2524_v6  ;;  %v2529_v54 = vadd.f32 %v2465_v4, %v4320_v19  ;;  %v2463_v57 = vmax.f32 %v2268_v12, 0.0 }
 0x46b   :  { %v3253_v60 = vpop.f32.mrf.mxu0 }
 0x46c   :  { %2593 = vst [vmem:[#allocation8 + $0xb0] sm:$0xff] %v2529_v54  ;;  %v2527_v33 = vadd.f32 %v2463_v57, %v4312_v16  ;;  %v2466_v14 = vmax.f32 %v3253_v60, 0.0 }
 0x46d   :  { %v2271_v21 = vpop.f32.mrf.mxu0 }
 0x46e   :  { %2591 = vst [vmem:[#allocation8 + $0xa0] sm:$0xff] %v2527_v33  ;;  %v2530_v52 = vadd.f32 %v2466_v14, %v4308_v34  ;;  %v2464_v53 = vmax.f32 %v2271_v21, 0.0 }
 0x46f   :  { %v3256_v59 = vpop.f32.mrf.mxu0 }
 0x470   :  { %2594 = vst [vmem:[#allocation8 + $0xb8] sm:$0xff] %v2530_v52  ;;  %v2528_v2 = vadd.f32 %v2464_v53, %v4911_v36  ;;  %v2469_v25 = vmax.f32 %v3256_v59, 0.0 }
 0x471   :  { %v2284_v61 = vpop.f32.mrf.mxu0 }
 0x472   :  { %2592 = vst [vmem:[#allocation8 + $0xa8] sm:$0xff] %v2528_v2  ;;  %v2533_v19 = vadd.f32 %v2469_v25, %v4340_v43  ;;  %v2467_v47 = vmax.f32 %v2284_v61, 0.0 }
 0x473   :  { %v3257_v24 = vpop.f32.mrf.mxu0 }
 0x474   :  { %2597 = vst [vmem:[#allocation8 + $0xd0] sm:$0xff] %v2533_v19  ;;  %v2531_v16 = vadd.f32 %v2467_v47, %v4332_v26  ;;  %v2470_v18 = vmax.f32 %v3257_v24, 0.0 }
 0x475   :  { %v2287_v56 = vpop.f32.mrf.mxu0 }
 0x476   :  { %2595 = vst [vmem:[#allocation8 + $0xc0] sm:$0xff] %v2531_v16  ;;  %v2534_v34 = vadd.f32 %v2470_v18, %v4328_v20  ;;  %v2468_v17 = vmax.f32 %v2287_v56, 0.0 }
 0x477   :  { %v3260_v31 = vpop.f32.mrf.mxu0 }
 0x478   :  { %2598 = vst [vmem:[#allocation8 + $0xd8] sm:$0xff] %v2534_v34  ;;  %v2532_v32 = vadd.f32 %v2468_v17, %v4336_v49  ;;  %v2473_v62 = vmax.f32 %v3260_v31, 0.0 }
 0x479   :  { %v2300_v41 = vpop.f32.mrf.mxu0 }
 0x47a   :  { %2596 = vst [vmem:[#allocation8 + $0xc8] sm:$0xff] %v2532_v32  ;;  %v2537_v43 = vadd.f32 %v2473_v62, %v4360_v23  ;;  %v2471_v22 = vmax.f32 %v2300_v41, 0.0  ;;  %v4912_v32 = vld [vmem:[#allocation31_spill] sm:$0xff] }
 0x47b   :  { %v3261_v30 = vpop.f32.mrf.mxu0 }
 0x47c   :  { %2601 = vst [vmem:[#allocation8 + $0xf0] sm:$0xff] %v2537_v43  ;;  %v2535_v26 = vadd.f32 %v2471_v22, %v4352_v51  ;;  %v2474_v29 = vmax.f32 %v3261_v30, 0.0  ;;  %v4913_v43 = vld [vmem:[#allocation32_spill] sm:$0xff] }
 0x47d   :  { %v2303_v42 = vpop.f32.mrf.mxu0 }
 0x47e   :  { %2599 = vst [vmem:[#allocation8 + $0xe0] sm:$0xff] %v2535_v26  ;;  %v2538_v20 = vadd.f32 %v2474_v29, %v4348_v58  ;;  %v2472_v44 = vmax.f32 %v2303_v42, 0.0 }
 0x47f   :  { %v3264_v37 = vpop.f32.mrf.mxu0 }
 0x480   :  { %2602 = vst [vmem:[#allocation8 + $0xf8] sm:$0xff] %v2538_v20  ;;  %v2536_v49 = vadd.f32 %v2472_v44, %v4356_v55  ;;  %v2477_v0 = vmax.f32 %v3264_v37, 0.0 }
 0x481   :  { %v2316_v48 = vpop.f32.mrf.mxu0 }
 0x482   :  { %2600 = vst [vmem:[#allocation8 + $0xe8] sm:$0xff] %v2536_v49  ;;  %v2541_v23 = vadd.f32 %v2477_v0, %v4380_v8  ;;  %v2475_v63 = vmax.f32 %v2316_v48, 0.0  ;;  %v4914_v0 = vld [vmem:[#allocation29_spill] sm:$0xff] }
 0x483   :  { %v3265_v9 = vpop.f32.mrf.mxu0 }
 0x484   :  { %2605 = vst [vmem:[#allocation8 + $0x110] sm:$0xff] %v2541_v23  ;;  %v2539_v51 = vadd.f32 %v2475_v63, %v4372_v13  ;;  %v2478_v45 = vmax.f32 %v3265_v9, 0.0  ;;  %v4915_v9 = vld [vmem:[#allocation35_spill] sm:$0xff] }
 0x485   :  { %v2319_v6 = vpop.f32.mrf.mxu0 }
 0x486   :  { %2603 = vst [vmem:[#allocation8 + $0x100] sm:$0xff] %v2539_v51  ;;  %v2542_v58 = vadd.f32 %v2478_v45, %v4368_v10  ;;  %v2476_v4 = vmax.f32 %v2319_v6, 0.0  ;;  %v4916_v6 = vld [vmem:[#allocation33_spill] sm:$0xff] }
 0x487   :  { %v3268_v12 = vpop.f32.mrf.mxu0 }
 0x488   :  { %2606 = vst [vmem:[#allocation8 + $0x118] sm:$0xff] %v2542_v58  ;;  %v2540_v55 = vadd.f32 %v2476_v4, %v4376_v15  ;;  %v2481_v54 = vmax.f32 %v3268_v12, 0.0  ;;  %v4917_v12 = vld [vmem:[#allocation30_spill] sm:$0xff] }
 0x489   :  { %v2332_v57 = vpop.f32.mrf.mxu0 }
 0x48a   :  { %2604 = vst [vmem:[#allocation8 + $0x108] sm:$0xff] %v2540_v55  ;;  %v2545_v8 = vadd.f32 %v2481_v54, %v4400_v11  ;;  %v2479_v60 = vmax.f32 %v2332_v57, 0.0  ;;  %v4918_v57 = vld [vmem:[#allocation34_spill] sm:$0xff] }
 0x48b   :  { %v3269_v33 = vpop.f32.mrf.mxu0 }
 0x48c   :  { %2609 = vst [vmem:[#allocation8 + $0x130] sm:$0xff] %v2545_v8  ;;  %v2543_v13 = vadd.f32 %v2479_v60, %v4392_v35  ;;  %v2482_v14 = vmax.f32 %v3269_v33, 0.0 }
 0x48d   :  { %v2335_v21 = vpop.f32.mrf.mxu0 }
 0x48e   :  { %2607 = vst [vmem:[#allocation8 + $0x120] sm:$0xff] %v2543_v13  ;;  %v2546_v10 = vadd.f32 %v2482_v14, %v4388_v38  ;;  %v2480_v52 = vmax.f32 %v2335_v21, 0.0  ;;  %v4919_v13 = vld [vmem:[#allocation38_spill] sm:$0xff] }
 0x48f   :  { %v3272_v53 = vpop.f32.mrf.mxu0 }
 0x490   :  { %2610 = vst [vmem:[#allocation8 + $0x138] sm:$0xff] %v2546_v10  ;;  %v2544_v15 = vadd.f32 %v2480_v52, %v4396_v28  ;;  %v2485_v59 = vmax.f32 %v3272_v53, 0.0  ;;  %v4920_v52 = vld [vmem:[#allocation36_spill] sm:$0xff] }
 0x491   :  { %v2348_v36 = vpop.f32.mrf.mxu0 }
 0x492   :  { %2608 = vst [vmem:[#allocation8 + $0x128] sm:$0xff] %v2544_v15  ;;  %v2549_v11 = vadd.f32 %v2485_v59, %v4420_v40  ;;  %v2483_v2 = vmax.f32 %v2348_v36, 0.0  ;;  %v4921_v36 = vld [vmem:[#allocation37_spill] sm:$0xff] }
 0x493   :  { %v3273_v25 = vpop.f32.mrf.mxu0 }
 0x494   :  { %2613 = vst [vmem:[#allocation8 + $0x150] sm:$0xff] %v2549_v11  ;;  %v2547_v35 = vadd.f32 %v2483_v2, %v4412_v5  ;;  %v2486_v61 = vmax.f32 %v3273_v25, 0.0 }
 0x495   :  { %v2351_v19 = vpop.f32.mrf.mxu0 }
 0x496   :  { %2611 = vst [vmem:[#allocation8 + $0x140] sm:$0xff] %v2547_v35  ;;  %v2550_v38 = vadd.f32 %v2486_v61, %v4408_v39  ;;  %v2484_v47 = vmax.f32 %v2351_v19, 0.0  ;;  %v4922_v35 = vld [vmem:[#allocation39_spill] sm:$0xff] }
 0x497   :  { %v3276_v24 = vpop.f32.mrf.mxu0 }
 0x498   :  { %2614 = vst [vmem:[#allocation8 + $0x158] sm:$0xff] %v2550_v38  ;;  %v2548_v28 = vadd.f32 %v2484_v47, %v4416_v3  ;;  %v2489_v16 = vmax.f32 %v3276_v24, 0.0  ;;  %v4923_v47 = vld [vmem:[#allocation42_spill] sm:$0xff] }
 0x499   :  { %v2364_v18 = vpop.f32.mrf.mxu0 }
 0x49a   :  { %2612 = vst [vmem:[#allocation8 + $0x148] sm:$0xff] %v2548_v28  ;;  %v2553_v40 = vadd.f32 %v2489_v16, %v4440_v7  ;;  %v2487_v56 = vmax.f32 %v2364_v18, 0.0  ;;  %v4924_v18 = vld [vmem:[#allocation40_spill] sm:$0xff] }
 0x49b   :  { %v3277_v34 = vpop.f32.mrf.mxu0 }
 0x49c   :  { %2617 = vst [vmem:[#allocation8 + $0x170] sm:$0xff] %v2553_v40  ;;  %v2551_v5 = vadd.f32 %v2487_v56, %v4432_v1  ;;  %v2490_v17 = vmax.f32 %v3277_v34, 0.0 }
 0x49d   :  { %v2367_v31 = vpop.f32.mrf.mxu0 }
 0x49e   :  { %2615 = vst [vmem:[#allocation8 + $0x160] sm:$0xff] %v2551_v5  ;;  %v2554_v39 = vadd.f32 %v2490_v17, %v4912_v32  ;;  %v2488_v62 = vmax.f32 %v2367_v31, 0.0  ;;  %v4925_v5 = vld [vmem:[#allocation41_spill] sm:$0xff]  ;;  %v4926_v32 = vld [vmem:[#allocation43_spill] sm:$0xff] }
 0x49f   :  { %v3280_v41 = vpop.f32.mrf.mxu0 }
 0x4a0   :  { %2618 = vst [vmem:[#allocation8 + $0x178] sm:$0xff] %v2554_v39  ;;  %v2552_v3 = vadd.f32 %v2488_v62, %v4913_v43  ;;  %v2493_v22 = vmax.f32 %v3280_v41, 0.0 }
 0x4a1   :  { %v2380_v30 = vpop.f32.mrf.mxu0 }
 0x4a2   :  { %2616 = vst [vmem:[#allocation8 + $0x168] sm:$0xff] %v2552_v3  ;;  %v2557_v7 = vadd.f32 %v2493_v22, %v4460_v27  ;;  %v2491_v26 = vmax.f32 %v2380_v30, 0.0 }
 0x4a3   :  { %v3281_v29 = vpop.f32.mrf.mxu0 }
 0x4a4   :  { %2621 = vst [vmem:[#allocation8 + $0x190] sm:$0xff] %v2557_v7  ;;  %v2555_v1 = vadd.f32 %v2491_v26, %v4452_v46  ;;  %v2494_v42 = vmax.f32 %v3281_v29, 0.0 }
 0x4a5   :  { %v2383_v20 = vpop.f32.mrf.mxu0 }
 0x4a6   :  { %2619 = vst [vmem:[#allocation8 + $0x180] sm:$0xff] %v2555_v1  ;;  %v2558_v44 = vadd.f32 %v2494_v42, %v4448_v50  ;;  %v2492_v37 = vmax.f32 %v2383_v20, 0.0 }
 0x4a7   :  { %v3284_v49 = vpop.f32.mrf.mxu0 }
 0x4a8   :  { %2622 = vst [vmem:[#allocation8 + $0x198] sm:$0xff] %v2558_v44  ;;  %v2556_v48 = vadd.f32 %v2492_v37, %v4914_v0  ;;  %v2497_v23 = vmax.f32 %v3284_v49, 0.0 }
 0x4a9   :  { %v2396_v63 = vpop.f32.mrf.mxu0 }
 0x4aa   :  { %2620 = vst [vmem:[#allocation8 + $0x188] sm:$0xff] %v2556_v48  ;;  %v2561_v27 = vadd.f32 %v2497_v23, %v4915_v9  ;;  %v2495_v51 = vmax.f32 %v2396_v63, 0.0 }
 0x4ab   :  { %v3285_v45 = vpop.f32.mrf.mxu0 }
 0x4ac   :  { %2625 = vst [vmem:[#allocation8 + $0x1b0] sm:$0xff] %v2561_v27  ;;  %v2559_v46 = vadd.f32 %v2495_v51, %v4916_v6  ;;  %v2498_v58 = vmax.f32 %v3285_v45, 0.0 }
 0x4ad   :  { %v2399_v4 = vpop.f32.mrf.mxu0 }
 0x4ae   :  { %2623 = vst [vmem:[#allocation8 + $0x1a0] sm:$0xff] %v2559_v46  ;;  %v2562_v50 = vadd.f32 %v2498_v58, %v4917_v12  ;;  %v2496_v55 = vmax.f32 %v2399_v4, 0.0 }
 0x4af   :  { %v3288_v54 = vpop.f32.mrf.mxu0 }
 0x4b0   :  { %2626 = vst [vmem:[#allocation8 + $0x1b8] sm:$0xff] %v2562_v50  ;;  %v2560_v8 = vadd.f32 %v2496_v55, %v4918_v57  ;;  %v2501_v60 = vmax.f32 %v3288_v54, 0.0 }
 0x4b1   :  { %v2412_v33 = vpop.f32.mrf.mxu0 }
 0x4b2   :  { %2624 = vst [vmem:[#allocation8 + $0x1a8] sm:$0xff] %v2560_v8  ;;  %v2565_v14 = vadd.f32 %v2501_v60, %v4919_v13  ;;  %v2499_v21 = vmax.f32 %v2412_v33, 0.0 }
 0x4b3   :  { %v3289_v10 = vpop.f32.mrf.mxu0 }
 0x4b4   :  { %2629 = vst [vmem:[#allocation8 + $0x1d0] sm:$0xff] %v2565_v14  ;;  %v2563_v53 = vadd.f32 %v2499_v21, %v4920_v52  ;;  %v2502_v15 = vmax.f32 %v3289_v10, 0.0 }
 0x4b5   :  { %v2415_v59 = vpop.f32.mrf.mxu0 }
 0x4b6   :  { %2627 = vst [vmem:[#allocation8 + $0x1c0] sm:$0xff] %v2563_v53  ;;  %v2566_v11 = vadd.f32 %v2502_v15, %v4921_v36  ;;  %v2500_v2 = vmax.f32 %v2415_v59, 0.0 }
 0x4b7   :  { %v3292_v25 = vpop.f32.mrf.mxu0 }
 0x4b8   :  { %2630 = vst [vmem:[#allocation8 + $0x1d8] sm:$0xff] %v2566_v11  ;;  %v2564_v61 = vadd.f32 %v2500_v2, %v4922_v35  ;;  %v2505_v19 = vmax.f32 %v3292_v25, 0.0 }
 0x4b9   :  { %v2428_v38 = vpop.f32.mrf.mxu0 }
 0x4ba   :  { %2628 = vst [vmem:[#allocation8 + $0x1c8] sm:$0xff] %v2564_v61  ;;  %v2569_v24 = vadd.f32 %v2505_v19, %v4923_v47  ;;  %v2503_v28 = vmax.f32 %v2428_v38, 0.0 }
 0x4bb   :  { %v3293_v16 = vpop.f32.mrf.mxu0 }
 0x4bc   :  { %2633 = vst [vmem:[#allocation8 + $0x1f0] sm:$0xff] %v2569_v24  ;;  %v2567_v40 = vadd.f32 %v2503_v28, %v4924_v18  ;;  %v2506_v56 = vmax.f32 %v3293_v16, 0.0 }
 0x4bd   :  { %v2431_v34 = vpop.f32.mrf.mxu0 }
 0x4be   :  { %2631 = vst [vmem:[#allocation8 + $0x1e0] sm:$0xff] %v2567_v40  ;;  %v2570_v17 = vadd.f32 %v2506_v56, %v4925_v5  ;;  %v2504_v31 = vmax.f32 %v2431_v34, 0.0 }
 0x4c0   :  { %2634 = vst [vmem:[#allocation8 + $0x1f8] sm:$0xff] %v2570_v17  ;;  %v2568_v39 = vadd.f32 %v2504_v31, %v4926_v32 }
 0x4c2   :  { %2632 = vst [vmem:[#allocation8 + $0x1e8] sm:$0xff] %v2568_v39 }
 0x4c3   :  { %3429 = shalt.err (!%p3426_p5)
}
 0x4c4   :  { %2646 = dma.vmem_to_hbm [thread:$0]  %s2641_s7, 8192, %s4600_s4, [#allocation4], %s3448_s25, %s3448_s25, %s3449_s26  }
 0x4c5   :  { %3442 = dma.done.wait [#allocation4], 8192  }
 0x4c6   :  { %3443 = vsyncadd [#allocation4], 4294959104 }
 0x4c7   :  { %2650 = vsyncpa [#allocation3], 1 }
 0x4c8   :  { %2651 = vsyncpa [#allocation6], 1 }
 0x4c9   :  { %2652 = vsyncpa [#allocation4], 1 }

</bundles_post_ra>
